<compile_context>
chip_gen: v6e
topology: v6e:2x2x1
jax: 0.10.0
libtpu: 0.0.40
codegen_flags: <defaults>
</compile_context>

<pallas_src>
import functools

import jax
import jax.numpy as jnp
from jax import lax
from jax.experimental import pallas as pl
from jax.experimental.pallas import tpu as pltpu


def _mlp_kernel(x_ref,
                w1_ref, b1_ref,
                w2_ref, b2_ref,
                w3_ref, b3_ref,
                w4_ref, b4_ref,
                o_ref):
    """Fused MLP on one batch tile.

    x_ref  : (T, in_ch)    bf16
    w*_ref : bf16, stored [in, out]; w4 stored transposed as a (1, 16) row
    b*_ref : f32, (1, out)
    o_ref  : (1, 1, T) f32 -- lane-dense output (batch along lanes)
    """
    x = x_ref[...]

    h = jnp.dot(x, w1_ref[...], preferred_element_type=jnp.float32) + b1_ref[...]
    h = jnp.maximum(h, 0.0).astype(jnp.bfloat16)

    h = jnp.dot(h, w2_ref[...], preferred_element_type=jnp.float32) + b2_ref[...]
    h = jnp.maximum(h, 0.0).astype(jnp.bfloat16)

    h = jnp.dot(h, w3_ref[...], preferred_element_type=jnp.float32) + b3_ref[...]
    h = jnp.maximum(h, 0.0).astype(jnp.bfloat16)              # (T, 16)

    # fc4 (16 -> 1), done transposed so the scalar-per-row result lands on lanes:
    #   (1, 16) contracted against (T, 16) on the 16-dim  ->  (1, T)
    out = lax.dot_general(
        w4_ref[...], h,
        dimension_numbers=(((1,), (1,)), ((), ())),
        preferred_element_type=jnp.float32,
    ) + b4_ref[...]                                           # (1, T) + (1, 1)

    o_ref[...] = out[None].astype(o_ref.dtype)                # (1, 1, T)


@functools.partial(jax.jit, static_argnames=("batch_tile",))
def baseline_1_forward(x, params, *, batch_tile=256):
    """x: [B, in_channels] float32.  params: dict of (W[in,out], b[1,out]) f32 pairs."""
    B, in_ch = x.shape

    # Pad the batch to a multiple of the lane-aligned batch tile.
    n_tiles = -(-B // batch_tile)
    B_pad = n_tiles * batch_tile
    if B_pad != B:
        x = jnp.pad(x, ((0, B_pad - B), (0, 0)))

    w1, b1 = params["fc1"]
    w2, b2 = params["fc2"]
    w3, b3 = params["fc3"]
    w4, b4 = params["fc4"]

    d1, d2, d3 = w1.shape[1], w2.shape[1], w3.shape[1]

    # bf16 inputs for the MXU; biases stay f32 for the VPU bias+ReLU.
    xb = x.astype(jnp.bfloat16)
    w1b = w1.astype(jnp.bfloat16)
    w2b = w2.astype(jnp.bfloat16)
    w3b = w3.astype(jnp.bfloat16)
    w4b = w4.T.astype(jnp.bfloat16)          # (1, 16) row

    full = lambda shape: pl.BlockSpec(shape, lambda i: (0, 0))

    out = pl.pallas_call(
        _mlp_kernel,
        out_shape=jax.ShapeDtypeStruct((n_tiles, 1, batch_tile), jnp.float32),
        grid_spec=pltpu.PrefetchScalarGridSpec(
            num_scalar_prefetch=0,
            grid=(n_tiles,),
            in_specs=[
                pl.BlockSpec((batch_tile, in_ch), lambda i: (i, 0)),   # x tile
                full((in_ch, d1)), full((1, d1)),                      # fc1
                full((d1, d2)),    full((1, d2)),                      # fc2
                full((d2, d3)),    full((1, d3)),                      # fc3
                full((1, d3)),     full((1, 1)),                       # fc4 (transposed w)
            ],
            out_specs=pl.BlockSpec((1, 1, batch_tile), lambda i: (i, 0, 0)),
        ),
        compiler_params=pltpu.CompilerParams(
            dimension_semantics=("parallel",),
        ),
    )(xb, w1b, b1, w2b, b2, w3b, b3, w4b, b4)

    # (n_tiles, 1, batch_tile) -> (B, 1)
    return out.reshape(B_pad, 1)[:B]


def init_params(key, in_channels):
    """Deterministic synthetic init (uniform, PyTorch-Linear-style bounds), f32."""
    dims = [(in_channels, 300), (300, 100), (100, 16), (16, 1)]
    names = ["fc1", "fc2", "fc3", "fc4"]
    params = {}
    for name, (fan_in, fan_out) in zip(names, dims):
        key, kw, kb = jax.random.split(key, 3)
        bound = 1.0 / jnp.sqrt(fan_in)
        # stored as [in, out] so the kernel computes x @ W + b
        w = jax.random.uniform(kw, (fan_in, fan_out), jnp.float32, -bound, bound)
        b = jax.random.uniform(kb, (1, fan_out), jnp.float32, -bound, bound)
        params[name] = (w, b)
    return params


def _reference(x, params):
    h = x
    for name in ["fc1", "fc2", "fc3"]:
        w, b = params[name]
        h = jnp.maximum(h @ w + b, 0.0)
    w, b = params["fc4"]
    return h @ w + b


if __name__ == "__main__":
    key = jax.random.PRNGKey(0)
    in_channels = 32
    batch = 300   # not a multiple of the tile: exercises padding; pads to 512 -> 2 grid steps

    kx, kp = jax.random.split(key)
    x = jax.random.normal(kx, (batch, in_channels), jnp.float32)
    params = init_params(kp, in_channels)

    out = baseline_1_forward(x, params)
    out = jax.block_until_ready(out)

    ref = _reference(x, params)
    assert out.shape == (batch, 1)
    # bf16 MXU inputs with f32 accumulation -> slightly looser tolerance vs f32 reference
    assert jnp.allclose(out, ref, atol=3e-2, rtol=3e-2), float(jnp.max(jnp.abs(out - ref)))

    print("KERNEL_OK")
</pallas_src>

<mosaic_0001>
module attributes {stable_mosaic.version = 11 : i64} {
  func.func @_mlp_kernel(%arg0: i32, %arg1: memref<256x32xbf16, #tpu.memory_space<vmem>>, %arg2: memref<32x300xbf16, #tpu.memory_space<vmem>>, %arg3: memref<1x300xf32, #tpu.memory_space<vmem>>, %arg4: memref<300x100xbf16, #tpu.memory_space<vmem>>, %arg5: memref<1x100xf32, #tpu.memory_space<vmem>>, %arg6: memref<100x16xbf16, #tpu.memory_space<vmem>>, %arg7: memref<1x16xf32, #tpu.memory_space<vmem>>, %arg8: memref<1x16xbf16, #tpu.memory_space<vmem>>, %arg9: memref<1x1xf32, #tpu.memory_space<vmem>>, %arg10: memref<1x1x256xf32, #tpu.memory_space<vmem>>) attributes {dimension_semantics = [#tpu.dimension_semantics<parallel>], iteration_bounds = array<i64: 2>, scalar_prefetch = 0 : i64, scratch_operands = 0 : i64, tpu.core_type = #tpu.core_type<tc>, window_params = [{transform_indices = @transform_0, window_bounds = array<i64: 256, 32>}, {pipeline_mode = #tpu.pipeline_mode<synchronous>, transform_indices = @transform_1, window_bounds = array<i64: 32, 300>}, {pipeline_mode = #tpu.pipeline_mode<synchronous>, transform_indices = @transform_2, window_bounds = array<i64: 1, 300>}, {pipeline_mode = #tpu.pipeline_mode<synchronous>, transform_indices = @transform_3, window_bounds = array<i64: 300, 100>}, {pipeline_mode = #tpu.pipeline_mode<synchronous>, transform_indices = @transform_4, window_bounds = array<i64: 1, 100>}, {pipeline_mode = #tpu.pipeline_mode<synchronous>, transform_indices = @transform_5, window_bounds = array<i64: 100, 16>}, {pipeline_mode = #tpu.pipeline_mode<synchronous>, transform_indices = @transform_6, window_bounds = array<i64: 1, 16>}, {pipeline_mode = #tpu.pipeline_mode<synchronous>, transform_indices = @transform_7, window_bounds = array<i64: 1, 16>}, {pipeline_mode = #tpu.pipeline_mode<synchronous>, transform_indices = @transform_8, window_bounds = array<i64: 1, 1>}, {transform_indices = @transform_9, window_bounds = array<i64: 1, 1, 256>}]} {
    %c0 = arith.constant 0 : index
    %c0_0 = arith.constant 0 : index
    %0 = vector.load %arg1[%c0, %c0_0] : memref<256x32xbf16, #tpu.memory_space<vmem>>, vector<256x32xbf16>
    %c0_1 = arith.constant 0 : index
    %c0_2 = arith.constant 0 : index
    %1 = vector.load %arg2[%c0_1, %c0_2] : memref<32x300xbf16, #tpu.memory_space<vmem>>, vector<32x300xbf16>
    %cst = arith.constant dense<0.000000e+00> : vector<256x300xf32>
    %2 = tpu.matmul %0, %1, %cst {dimension_numbers = #tpu.dot_dimension_numbers<[1], [0], [0], [1], [0, 0, 1, 1], [], []>} : vector<256x32xbf16>, vector<32x300xbf16>, vector<256x300xf32> -> vector<256x300xf32>
    %c0_3 = arith.constant 0 : index
    %c0_4 = arith.constant 0 : index
    %3 = vector.load %arg3[%c0_3, %c0_4] : memref<1x300xf32, #tpu.memory_space<vmem>>, vector<1x300xf32>
    %4 = vector.broadcast %3 : vector<1x300xf32> to vector<256x300xf32>
    %5 = arith.addf %2, %4 : vector<256x300xf32>
    %cst_5 = arith.constant 0.000000e+00 : f32
    %6 = vector.broadcast %cst_5 : f32 to vector<256x300xf32>
    %7 = arith.maximumf %5, %6 : vector<256x300xf32>
    %8 = arith.truncf %7 : vector<256x300xf32> to vector<256x300xbf16>
    %c0_6 = arith.constant 0 : index
    %c0_7 = arith.constant 0 : index
    %9 = vector.load %arg4[%c0_6, %c0_7] : memref<300x100xbf16, #tpu.memory_space<vmem>>, vector<300x100xbf16>
    %cst_8 = arith.constant dense<0.000000e+00> : vector<256x100xf32>
    %10 = tpu.matmul %8, %9, %cst_8 {dimension_numbers = #tpu.dot_dimension_numbers<[1], [0], [0], [1], [0, 0, 1, 1], [], []>} : vector<256x300xbf16>, vector<300x100xbf16>, vector<256x100xf32> -> vector<256x100xf32>
    %c0_9 = arith.constant 0 : index
    %c0_10 = arith.constant 0 : index
    %11 = vector.load %arg5[%c0_9, %c0_10] : memref<1x100xf32, #tpu.memory_space<vmem>>, vector<1x100xf32>
    %12 = vector.broadcast %11 : vector<1x100xf32> to vector<256x100xf32>
    %13 = arith.addf %10, %12 : vector<256x100xf32>
    %cst_11 = arith.constant 0.000000e+00 : f32
    %14 = vector.broadcast %cst_11 : f32 to vector<256x100xf32>
    %15 = arith.maximumf %13, %14 : vector<256x100xf32>
    %16 = arith.truncf %15 : vector<256x100xf32> to vector<256x100xbf16>
    %c0_12 = arith.constant 0 : index
    %c0_13 = arith.constant 0 : index
    %17 = vector.load %arg6[%c0_12, %c0_13] : memref<100x16xbf16, #tpu.memory_space<vmem>>, vector<100x16xbf16>
    %cst_14 = arith.constant dense<0.000000e+00> : vector<256x16xf32>
    %18 = tpu.matmul %16, %17, %cst_14 {dimension_numbers = #tpu.dot_dimension_numbers<[1], [0], [0], [1], [0, 0, 1, 1], [], []>} : vector<256x100xbf16>, vector<100x16xbf16>, vector<256x16xf32> -> vector<256x16xf32>
    %c0_15 = arith.constant 0 : index
    %c0_16 = arith.constant 0 : index
    %19 = vector.load %arg7[%c0_15, %c0_16] : memref<1x16xf32, #tpu.memory_space<vmem>>, vector<1x16xf32>
    %20 = vector.broadcast %19 : vector<1x16xf32> to vector<256x16xf32>
    %21 = arith.addf %18, %20 : vector<256x16xf32>
    %cst_17 = arith.constant 0.000000e+00 : f32
    %22 = vector.broadcast %cst_17 : f32 to vector<256x16xf32>
    %23 = arith.maximumf %21, %22 : vector<256x16xf32>
    %24 = arith.truncf %23 : vector<256x16xf32> to vector<256x16xbf16>
    %c0_18 = arith.constant 0 : index
    %c0_19 = arith.constant 0 : index
    %25 = vector.load %arg8[%c0_18, %c0_19] : memref<1x16xbf16, #tpu.memory_space<vmem>>, vector<1x16xbf16>
    %cst_20 = arith.constant dense<0.000000e+00> : vector<1x256xf32>
    %26 = tpu.matmul %25, %24, %cst_20 {dimension_numbers = #tpu.dot_dimension_numbers<[1], [1], [0], [0], [0, 0, 1, 0], [], []>} : vector<1x16xbf16>, vector<256x16xbf16>, vector<1x256xf32> -> vector<1x256xf32>
    %c0_21 = arith.constant 0 : index
    %c0_22 = arith.constant 0 : index
    %27 = vector.load %arg9[%c0_21, %c0_22] : memref<1x1xf32, #tpu.memory_space<vmem>>, vector<1x1xf32>
    %28 = vector.broadcast %27 : vector<1x1xf32> to vector<1x256xf32>
    %29 = arith.addf %26, %28 : vector<1x256xf32>
    %30 = vector.shape_cast %29 : vector<1x256xf32> to vector<1x1x256xf32>
    %c0_23 = arith.constant 0 : index
    %c0_24 = arith.constant 0 : index
    %c0_25 = arith.constant 0 : index
    %31 = vector.load %arg10[%c0_23, %c0_24, %c0_25] : memref<1x1x256xf32, #tpu.memory_space<vmem>>, vector<1x1x256xf32>
    tpu.vector_store %arg10[%c0_23, %c0_24, %c0_25], %30 {strides = array<i32>} : memref<1x1x256xf32, #tpu.memory_space<vmem>>, vector<1x1x256xf32>,
    return
  }
  func.func @transform_0(%arg0: i32) -> (i32, i32) {
    %c0_i32 = arith.constant 0 : i32
    %c0_i32_0 = arith.constant 0 : i32
    return %arg0, %c0_i32 : i32, i32
  }
  func.func @transform_1(%arg0: i32) -> (i32, i32) {
    %c0_i32 = arith.constant 0 : i32
    %c0_i32_0 = arith.constant 0 : i32
    %c0_i32_1 = arith.constant 0 : i32
    return %c0_i32, %c0_i32_0 : i32, i32
  }
  func.func @transform_2(%arg0: i32) -> (i32, i32) {
    %c0_i32 = arith.constant 0 : i32
    %c0_i32_0 = arith.constant 0 : i32
    %c0_i32_1 = arith.constant 0 : i32
    return %c0_i32, %c0_i32_0 : i32, i32
  }
  func.func @transform_3(%arg0: i32) -> (i32, i32) {
    %c0_i32 = arith.constant 0 : i32
    %c0_i32_0 = arith.constant 0 : i32
    %c0_i32_1 = arith.constant 0 : i32
    return %c0_i32, %c0_i32_0 : i32, i32
  }
  func.func @transform_4(%arg0: i32) -> (i32, i32) {
    %c0_i32 = arith.constant 0 : i32
    %c0_i32_0 = arith.constant 0 : i32
    %c0_i32_1 = arith.constant 0 : i32
    return %c0_i32, %c0_i32_0 : i32, i32
  }
  func.func @transform_5(%arg0: i32) -> (i32, i32) {
    %c0_i32 = arith.constant 0 : i32
    %c0_i32_0 = arith.constant 0 : i32
    %c0_i32_1 = arith.constant 0 : i32
    return %c0_i32, %c0_i32_0 : i32, i32
  }
  func.func @transform_6(%arg0: i32) -> (i32, i32) {
    %c0_i32 = arith.constant 0 : i32
    %c0_i32_0 = arith.constant 0 : i32
    %c0_i32_1 = arith.constant 0 : i32
    return %c0_i32, %c0_i32_0 : i32, i32
  }
  func.func @transform_7(%arg0: i32) -> (i32, i32) {
    %c0_i32 = arith.constant 0 : i32
    %c0_i32_0 = arith.constant 0 : i32
    %c0_i32_1 = arith.constant 0 : i32
    return %c0_i32, %c0_i32_0 : i32, i32
  }
  func.func @transform_8(%arg0: i32) -> (i32, i32) {
    %c0_i32 = arith.constant 0 : i32
    %c0_i32_0 = arith.constant 0 : i32
    %c0_i32_1 = arith.constant 0 : i32
    return %c0_i32, %c0_i32_0 : i32, i32
  }
  func.func @transform_9(%arg0: i32) -> (i32, i32, i32) {
    %c0_i32 = arith.constant 0 : i32
    %c0_i32_0 = arith.constant 0 : i32
    %c0_i32_1 = arith.constant 0 : i32
    return %arg0, %c0_i32, %c0_i32_0 : i32, i32, i32
  }
}

</mosaic_0001>

<bundles_post_ra>
// kernel: baseline_1_forward.1
= control target key start
LH: loop header
LB: loop body
LE: loop exit
PB: predicated region body
PF: predicated region fallthrough
CT: control target
= control target key end

     0   :  { %s2707_s11 = smov 0   ;;  %s3208_s0 = inlined_call_operand.vmem [shape: bf16[512,32], index: 0, kind: input, shape index: {}]   ;;  %s3209_s1 = inlined_call_operand.vmem [shape: bf16[32,300], index: 1, kind: input, shape index: {}]   ;;  %s3210_s2 = inlined_call_operand.vmem [shape: f32[1,300], index: 2, kind: input, shape index: {}]   ;;  %s3211_s3 = inlined_call_operand.vmem [shape: bf16[300,100], index: 3, kind: input, shape index: {}]   ;;  %s3212_s4 = inlined_call_operand.vmem [shape: f32[1,100], index: 4, kind: input, shape index: {}]   ;;  %s3213_s5 = inlined_call_operand.vmem [shape: bf16[100,16], index: 5, kind: input, shape index: {}]   ;;  %s3214_s6 = inlined_call_operand.vmem [shape: f32[1,16], index: 6, kind: input, shape index: {}]   ;;  %s3215_s7 = inlined_call_operand.vmem [shape: bf16[1,16], index: 7, kind: input, shape index: {}]   ;;  %s3216_s8 = inlined_call_operand.<no memory space> [shape: f32[1,1], index: 8, kind: input, shape index: {}]   ;;  %s3217_s9 = inlined_call_operand.vmem [shape: f32[2,1,256], index: 9, kind: output, shape index: {}]  }
   0x1   :  { %v14_v0 = vstv %s3216_s8 }
   0x2   :  { %15 = vst [vmem:[#allocation2] sm:$0x1] %v14_v0 }
   0x3 LB: > { %s2713_s12 = sadd.s32 4294967295, %s2650_s11   ;;  %p2138_p0 = scmp.ge.s32.totalorder %s2650_s11, 1  ;;  %s2650_s11 = sphi %s2707_s11, %s21_s11  }
   0x4   : > { %p290_p1 = scmp.lt.s32.totalorder %s2650_s11, 3 }
   0x6   : > { %p291_p2 = pnand %p2138_p0, %p290_p1 }
   0x7   : > { %s2139_s8 = sshll.u32 (!%p291_p2), %s2713_s12, 5  ;;  %p331_p4 = scmp.lt.s32.totalorder (!%p291_p2), %s2713_s12, 1 }
   0x8   : > { %294 = sbr.rel (%p291_p2) target bundleno = 1029 (0x405), region = 56  ;;  %p326_p3 = scmp.lt.s32.totalorder (!%p291_p2), %s2139_s8, 63 }
   0xd   : > { %v2594_v1 = vld [vmem:[%s3209_s1 + $0x1c] ss:$12 sps:$4 sm:$0xff]   ;;  %v2596_v2 = vld [vmem:[%s3209_s1 + $0x18] ss:$12 sps:$4 sm:$0xff]   ;;  %v2652_v3 = vmov 0   ;;  %s3219_s8 = smov (!%p326_p3, %s2139_s8), 63  ;;  %v378_v44 = vlaneseq }
   0xe   : > { %586 = vmatprep.mubr.bf16.mxu0 %v2652_v3  ;;  %716 = vmatprep.mubr.bf16.mxu1 %v2652_v3  ;;  %v2597_v4 = vld [vmem:[%s3209_s1 + $0x4] ss:$12 sps:$4 sm:$0xff]   ;;  %v2599_v5 = vld [vmem:[%s3209_s1] ss:$12 sps:$4 sm:$0xff]   ;;  %s2140_s23 = sshll.u32 %s3219_s8, 2  ;;  %vm505_vm0 = vcmask 261120  }
   0xf   : > { %566 = vmatprep.subr.bf16.mxu0 %v2594_v1  ;;  %2569 = vmatprep.subr.bf16.mxu1 %v2594_v1  ;;  %v2606_v6 = vld [vmem:[%s3209_s1 + $0x20] ss:$12 sps:$4 sm:$0xff]   ;;  %s2739_s26 = scalar_lea.vmem %s3208_s0, %s2140_s23  ;;  %v2607_v9 = vld [vmem:[%s3209_s1 + $0x8] ss:$12 sps:$4 sm:$0xff]   ;;  %v2618_v10 = vld [vmem:[%s3211_s3 + $0x78] sm:$0xff]   ;;  %vm1259_vm1 = vcmask 1045504  }
  0x10   : > { %567 = vmatpush1.bf16.msra.mxu0 %v2596_v2  ;;  %2571 = vmatpush1.bf16.msra.mxu1 %v2596_v2  ;;  %v2600_v7 = vld [vmem:[%s2739_s26] sm:$0xff]   ;;  %v2743_v8 = vld [vmem:[%s2739_s26 + $0x68] sm:$0xff]   ;;  %v2758_v12 = vld [vmem:[%s2739_s26 + $0x70] sm:$0xff]   ;;  %v2876_v45 = vshrl.u32 %v378_v44, 7  ;;  %vm1210_vm2 = vcmask 359424   ;;  %vm1741_vm3 = vcmask 1041408  }
  0x11   : > { %568 = vmatprep.subr.bf16.mxu0 %v2597_v4  ;;  %2570 = vmatprep.subr.bf16.mxu1 %v2597_v4  ;;  %v2602_v11 = vld [vmem:[%s2739_s26 + $0x8] sm:$0xff]   ;;  %v2604_v13 = vld [vmem:[%s2739_s26 + $0x10] sm:$0xff]   ;;  %v2767_v14 = vld [vmem:[%s2739_s26 + $0x78] sm:$0xff]   ;;  %vm1692_vm4 = vcmask 818176   ;;  %vm1965_vm5 = vcmask 130048   ;;  %s3221_s12 = smov (!%p331_p4, %s2713_s12), 1 }
  0x12   : > { %2593 = vset.pattern.permute.xlu0 %v2652_v3  ;;  %v2608_v15 = vld [vmem:[%s2739_s26 + $0x18] sm:$0xff]   ;;  %v2620_v17 = vld [vmem:[%s3211_s3 + $0x70] sm:$0xff]   ;;  %v2622_v19 = vld [vmem:[%s3211_s3 + $0x68] sm:$0xff]   ;;  %v380_v46 = vsub.s32 0, %v2876_v45  ;;  %v384_v48 = vsub.s32 1, %v2876_v45  ;;  %s2141_s30 = sshll.u32 %s3221_s12, 1 }
  0x13   : > { %v2619_v16 = vld [vmem:[%s3211_s3 + $0x38] sm:$0xff]   ;;  %v2621_v18 = vld [vmem:[%s3211_s3 + $0x30] sm:$0xff]   ;;  %v2609_v20 = vld [vmem:[%s2739_s26 + $0x20] sm:$0xff]   ;;  %s334_s14 = scalar_lea.vmem %s3217_s9, %s2141_s30  ;;  %vm2078_vm6 = vcmp.lt.s32.totalorder %v378_v44, 256 }
  0x14   : > { %569 = vmatpush1.bf16.msra.mxu0 %v2599_v5  ;;  %2572 = vmatpush1.bf16.msra.mxu1 %v2599_v5  ;;  %v2623_v21 = vld [vmem:[%s3211_s3 + $0x28] sm:$0xff]   ;;  %v2624_v22 = vld [vmem:[%s3211_s3 + $0x60] sm:$0xff]   ;;  %v2626_v24 = vld [vmem:[%s3211_s3 + $0x58] sm:$0xff]  }
  0x15   : > { %2449 = vmatprep.subr.bf16.mxu1 %v2606_v6  ;;  %v2625_v23 = vld [vmem:[%s3211_s3 + $0x20] sm:$0xff]   ;;  %v2610_v25 = vld [vmem:[%s2739_s26 + $0x28] sm:$0xff]   ;;  %v2627_v26 = vld [vmem:[%s3211_s3 + $0x18] sm:$0xff]  }
  0x16   : > { %v2611_v27 = vld [vmem:[%s2739_s26 + $0x30] sm:$0xff]   ;;  %v2612_v28 = vld [vmem:[%s2739_s26 + $0x38] sm:$0xff]   ;;  %v2613_v29 = vld [vmem:[%s2739_s26 + $0x40] sm:$0xff]  }
  0x17   : > { %2164 = vmatmul.mubr.msk.bf16.vlgmr.msra.gmra.mxu0 %vm505_vm0, %v2600_v7  ;;  %2177 = vmatmul.mubr.msk.bf16.vlgmr.msra.gmra.mxu1 %vm505_vm0, %v2743_v8  ;;  %v2614_v30 = vld [vmem:[%s2739_s26 + $0x48] sm:$0xff]   ;;  %v2615_v31 = vld [vmem:[%s2739_s26 + $0x50] sm:$0xff]   ;;  %v2616_v32 = vld [vmem:[%s2739_s26 + $0x58] sm:$0xff]  }
  0x18   : > { %596 = vmatprep.mubr.bf16.mxu0 %v2652_v3  ;;  %726 = vmatprep.mubr.bf16.mxu1 %v2652_v3  ;;  %v2617_v33 = vld [vmem:[%s2739_s26 + $0x60] sm:$0xff]   ;;  %v2628_v34 = vld [vmem:[%s3211_s3 + $0x50] sm:$0xff]   ;;  %v2630_v36 = vld [vmem:[%s3211_s3 + $0x48] sm:$0xff]  }
  0x19   : > { %2450 = vmatpush3.bf16.msra.mxu1 %v2606_v6  ;;  %v2629_v35 = vld [vmem:[%s3211_s3 + $0x10] sm:$0xff]   ;;  %v2631_v37 = vld [vmem:[%s3211_s3 + $0x8] sm:$0xff]   ;;  %v2632_v38 = vld [vmem:[%s3211_s3 + $0x40] sm:$0xff]  }
  0x1a   : > { %2451 = vmatprep.subr.bf16.mxu1 %v2607_v9  ;;  %v2633_v39 = vld [vmem:[%s3211_s3] sm:$0xff]   ;;  %v2634_v40 = vld [vmem:[%s3211_s3 + $0x90] sm:$0x3f]   ;;  %v2635_v42 = vld [vmem:[%s3211_s3 + $0x88] sm:$0xff]  }
  0x1b   : > { %2573 = vmatprep.subr.msk.bf16.mxu0 %vm1259_vm1, %v2634_v40  ;;  %v1261_v41 = vsel %vm1259_vm1, %v2634_v40, 0  ;;  %v2636_v43 = vld [vmem:[%s3211_s3 + $0x80] sm:$0xff]  }
  0x1c   : > { %2486 = vmatpush3.bf16.msra.mxu0 %v1261_v41  ;;  %v2882_v47 = vld [vmem:[%s3210_s2] sm:$0x7] }
  0x1d   : > { %2452 = vmatpush3.bf16.msra.mxu1 %v2607_v9  ;;  %2487 = vmatprep.subr.bf16.mxu0 %v2635_v42  ;;  %v2888_v49 = vrot.slane %v2882_v47, %v380_v46  ;;  %v2892_v53 = vrot.slane %v2882_v47, %v384_v48 }
  0x1e   : > { %2277 = vmatprep.subr.bf16.mxu1 %v2618_v10 }
  0x1f   : > { %2165 = vmatmul.mubr.msk.bf16.gmra.mxu0 %vm505_vm0, %v2602_v11  ;;  %2178 = vmatmul.mubr.msk.bf16.gmra.mxu1 %vm505_vm0, %v2758_v12 }
  0x20   : > { %606 = vmatprep.mubr.bf16.mxu0 %v2652_v3  ;;  %736 = vmatprep.mubr.bf16.mxu1 %v2652_v3 }
  0x21   : > { %2488 = vmatpush3.bf16.msra.mxu0 %v2635_v42 }
  0x22   : > { %2489 = vmatprep.subr.bf16.mxu0 %v2636_v43 }
  0x25   : > { %2490 = vmatpush3.bf16.msra.mxu0 %v2636_v43 }
  0x27   : > { %2166 = vmatmul.mubr.msk.bf16.gmra.mxu0 %vm505_vm0, %v2604_v13  ;;  %2179 = vmatmul.mubr.msk.bf16.gmra.mxu1 %vm505_vm0, %v2767_v14 }
  0x28   : > { %616 = vmatprep.mubr.bf16.mxu0 %v2652_v3  ;;  %2453 = vmatprep.mubr.msk.bf16.mxu1 %vm505_vm0, %v2600_v7 }
  0x2f   : > { %2167 = vmatmul.mubr.msk.bf16.gmra.mxu0 %vm505_vm0, %v2608_v15  ;;  %2454 = vmatmul.mubr.msk.bf16.vlgmr.msra.gmra.mxu1 %vm505_vm0, %v2602_v11 }
  0x30   : > { %626 = vmatprep.mubr.bf16.mxu0 %v2652_v3  ;;  %2457 = vmatprep.mubr.msk.bf16.mxu1 %vm505_vm0, %v2604_v13 }
  0x31   : > { %2278 = vmatpush3.bf16.msra.mxu1 %v2619_v16 }
  0x32   : > { %2279 = vmatprep.subr.bf16.mxu1 %v2620_v17 }
  0x35   : > { %2280 = vmatpush3.bf16.msra.mxu1 %v2621_v18 }
  0x36   : > { %2281 = vmatprep.subr.bf16.mxu1 %v2622_v19 }
  0x37   : > { %2168 = vmatmul.mubr.msk.bf16.gmra.mxu0 %vm505_vm0, %v2609_v20  ;;  %2458 = vmatmul.mubr.msk.bf16.gmra.mxu1 %vm505_vm0, %v2608_v15 }
  0x38   : > { %636 = vmatprep.mubr.bf16.mxu0 %v2652_v3  ;;  %2461 = vmatprep.mubr.msk.bf16.mxu1 %vm505_vm0, %v2609_v20 }
  0x39   : > { %2282 = vmatpush3.bf16.msra.mxu1 %v2623_v21 }
  0x3a   : > { %2283 = vmatprep.subr.bf16.mxu1 %v2624_v22 }
  0x3d   : > { %2284 = vmatpush3.bf16.msra.mxu1 %v2625_v23 }
  0x3e   : > { %2285 = vmatprep.subr.bf16.mxu1 %v2626_v24 }
  0x3f   : > { %2169 = vmatmul.mubr.msk.bf16.gmra.mxu0 %vm505_vm0, %v2610_v25  ;;  %2462 = vmatmul.mubr.msk.bf16.gmra.mxu1 %vm505_vm0, %v2610_v25 }
  0x40   : > { %646 = vmatprep.mubr.bf16.mxu0 %v2652_v3  ;;  %2465 = vmatprep.mubr.msk.bf16.mxu1 %vm505_vm0, %v2611_v27 }
  0x41   : > { %2286 = vmatpush3.bf16.msra.mxu1 %v2627_v26 }
  0x42   : > { %2287 = vmatprep.subr.bf16.mxu1 %v2628_v34 }
  0x45   : > { %2288 = vmatpush3.bf16.msra.mxu1 %v2629_v35 }
  0x46   : > { %2289 = vmatprep.subr.bf16.mxu1 %v2630_v36 }
  0x47   : > { %2170 = vmatmul.mubr.msk.bf16.gmra.mxu0 %vm505_vm0, %v2611_v27  ;;  %2466 = vmatmul.mubr.msk.bf16.gmra.mxu1 %vm505_vm0, %v2612_v28 }
  0x48   : > { %656 = vmatprep.mubr.bf16.mxu0 %v2652_v3  ;;  %2469 = vmatprep.mubr.msk.bf16.mxu1 %vm505_vm0, %v2613_v29 }
  0x49   : > { %2290 = vmatpush3.bf16.msra.mxu1 %v2631_v37 }
  0x4a   : > { %2291 = vmatprep.subr.bf16.mxu1 %v2632_v38 }
  0x4d   : > { %2292 = vmatpush3.bf16.msra.mxu1 %v2633_v39 }
  0x4f   : > { %2171 = vmatmul.mubr.msk.bf16.gmra.mxu0 %vm505_vm0, %v2612_v28  ;;  %2470 = vmatmul.mubr.msk.bf16.gmra.mxu1 %vm505_vm0, %v2614_v30 }
  0x50   : > { %666 = vmatprep.mubr.bf16.mxu0 %v2652_v3  ;;  %2473 = vmatprep.mubr.msk.bf16.mxu1 %vm505_vm0, %v2615_v31 }
  0x57   : > { %2172 = vmatmul.mubr.msk.bf16.gmra.mxu0 %vm505_vm0, %v2613_v29  ;;  %2474 = vmatmul.mubr.msk.bf16.gmra.mxu1 %vm505_vm0, %v2616_v32 }
  0x58   : > { %676 = vmatprep.mubr.bf16.mxu0 %v2652_v3  ;;  %2477 = vmatprep.mubr.msk.bf16.mxu1 %vm505_vm0, %v2617_v33 }
  0x5f   : > { %2173 = vmatmul.mubr.msk.bf16.gmra.mxu0 %vm505_vm0, %v2614_v30  ;;  %2478 = vmatmul.mubr.msk.bf16.gmra.mxu1 %vm505_vm0, %v2743_v8 }
  0x60   : > { %686 = vmatprep.mubr.bf16.mxu0 %v2652_v3  ;;  %2481 = vmatprep.mubr.msk.bf16.mxu1 %vm505_vm0, %v2758_v12 }
  0x67   : > { %2174 = vmatmul.mubr.msk.bf16.gmra.mxu0 %vm505_vm0, %v2615_v31  ;;  %2482 = vmatmul.mubr.msk.bf16.gmra.mxu1 %vm505_vm0, %v2767_v14 }
  0x68   : > { %696 = vmatprep.mubr.bf16.mxu0 %v2652_v3 }
  0x6f   : > { %2175 = vmatmul.mubr.msk.bf16.gmra.mxu0 %vm505_vm0, %v2616_v32 }
  0x70   : > { %706 = vmatprep.mubr.bf16.mxu0 %v2652_v3 }
  0x77   : > { %2176 = vmatmul.mubr.msk.bf16.gmra.mxu0 %vm505_vm0, %v2617_v33 }
  0xd7   : > { %v588_v50 = vpop.f32.mrf.mxu0  ;;  %v718_v51 = vpop.f32.mrf.mxu1 }
  0xd8   : > { %v719_v52 = vadd.f32 %v718_v51, %v2888_v49  ;;  %v589_v63 = vadd.f32 %v588_v50, %v2888_v49  ;;  %v388_v50 = vsub.s32 2, %v2876_v45 }
  0xd9   : > { %v590_v54 = vpop.f32.mrf.mxu0  ;;  %v720_v55 = vpop.f32.mrf.mxu1 }
  0xda   : > { %v721_v56 = vadd.f32 %v720_v55, %v2892_v53  ;;  %v986_v59 = vmax.f32 %v719_v52, 0.0  ;;  %v591_v60 = vadd.f32 %v590_v54, %v2892_v53  ;;  %v908_v13 = vmax.f32 %v589_v63, 0.0 }
  0xdb   : > { %v592_v57 = vpop.f32.mrf.mxu0  ;;  %v722_v58 = vpop.f32.mrf.mxu1 }
  0xdc   : > { %v593_v61 = vadd.f32 %v592_v57, %v2888_v49  ;;  %v723_v62 = vadd.f32 %v722_v58, %v2888_v49  ;;  %v987_v2 = vmax.f32 %v721_v56, 0.0  ;;  %v909_v9 = vmax.f32 %v591_v60, 0.0 }
  0xdd   : > { %v594_v0 = vpop.f32.mrf.mxu0  ;;  %v724_v1 = vpop.f32.mrf.mxu1 }
  0xde   : > { %v989_v3 = vmax.f32 %v723_v62, 0.0  ;;  %v595_v4 = vadd.f32 %v594_v0, %v2892_v53  ;;  %v725_v5 = vadd.f32 %v724_v1, %v2892_v53  ;;  %v911_v6 = vmax.f32 %v593_v61, 0.0 }
  0xdf   : > { %v598_v7 = vpop.f32.mrf.mxu0  ;;  %v728_v8 = vpop.f32.mrf.mxu1  ;;  %v2925_v1 = vrot.slane %v2882_v47, %v388_v50 }
  0xe0   : > { %v2901_v10 = vpack.c.bf16 %v989_v3, %v986_v59  ;;  %v912_v11 = vmax.f32 %v595_v4, 0.0  ;;  %v990_v12 = vmax.f32 %v725_v5, 0.0  ;;  %v729_v14 = vadd.f32 %v728_v8, %v2888_v49 }
  0xe1   : > { %v600_v15 = vpop.f32.mrf.mxu0  ;;  %v730_v16 = vpop.f32.mrf.mxu1  ;;  %v1004_v20 = vpack.c.bf16 %v911_v6, %v908_v13  ;;  %v599_v27 = vadd.f32 %v598_v7, %v2888_v49 }
  0xe2   : > { %v2904_v17 = vpack.c.bf16 %v990_v12, %v987_v2  ;;  %v731_v18 = vadd.f32 %v730_v16, %v2892_v53  ;;  %v1005_v19 = vpack.c.bf16 %v912_v11, %v909_v9  ;;  %v992_v23 = vmax.f32 %v729_v14, 0.0 }
  0xe3   : > { %v602_v21 = vpop.f32.mrf.mxu0  ;;  %v732_v22 = vpop.f32.mrf.mxu1  ;;  %v601_v24 = vadd.f32 %v600_v15, %v2892_v53  ;;  %v914_v41 = vmax.f32 %v599_v27, 0.0 }
  0xe4   : > { %v603_v25 = vadd.f32 %v602_v21, %v2888_v49  ;;  %v733_v26 = vadd.f32 %v732_v22, %v2888_v49  ;;  %1295 = vmatprep.mubr.bf16.mxu1 %v1005_v19  ;;  %v993_v30 = vmax.f32 %v731_v18, 0.0 }
  0xe5   : > { %v604_v28 = vpop.f32.mrf.mxu0  ;;  %v734_v29 = vpop.f32.mrf.mxu1  ;;  %1296 = vmatmul.mubr.bf16.vlgmr.msra.gmra.mxu1 %v1004_v20  ;;  %v915_v37 = vmax.f32 %v601_v24, 0.0 }
  0xe6   : > { %v995_v31 = vmax.f32 %v733_v26, 0.0  ;;  %v605_v32 = vadd.f32 %v604_v28, %v2892_v53  ;;  %v735_v33 = vadd.f32 %v734_v29, %v2892_v53  ;;  %v917_v34 = vmax.f32 %v603_v25, 0.0 }
  0xe7   : > { %v608_v35 = vpop.f32.mrf.mxu0  ;;  %v738_v36 = vpop.f32.mrf.mxu1 }
  0xe8   : > { %v2913_v38 = vpack.c.bf16 %v995_v31, %v992_v23  ;;  %v918_v39 = vmax.f32 %v605_v32, 0.0  ;;  %v996_v40 = vmax.f32 %v735_v33, 0.0  ;;  %v739_v42 = vadd.f32 %v738_v36, %v2888_v49 }
  0xe9   : > { %v610_v43 = vpop.f32.mrf.mxu0  ;;  %v740_v48 = vpop.f32.mrf.mxu1  ;;  %v1007_v55 = vpack.c.bf16 %v917_v34, %v914_v41  ;;  %v609_v62 = vadd.f32 %v608_v35, %v2888_v49 }
  0xea   : > { %v1008_v51 = vpack.c.bf16 %v918_v39, %v915_v37  ;;  %v2917_v52 = vpack.c.bf16 %v996_v40, %v993_v30  ;;  %v741_v54 = vadd.f32 %v740_v48, %v2892_v53  ;;  %v998_v58 = vmax.f32 %v739_v42, 0.0 }
  0xeb   : > { %v612_v56 = vpop.f32.mrf.mxu0  ;;  %v742_v57 = vpop.f32.mrf.mxu1  ;;  %v611_v59 = vadd.f32 %v610_v43, %v2892_v53  ;;  %v920_v14 = vmax.f32 %v609_v62, 0.0 }
  0xec   : > { %v613_v60 = vadd.f32 %v612_v56, %v2888_v49  ;;  %v743_v61 = vadd.f32 %v742_v57, %v2888_v49  ;;  %1303 = vmatprep.mubr.bf16.mxu1 %v1008_v51  ;;  %v999_v2 = vmax.f32 %v741_v54, 0.0 }
  0xed   : > { %v614_v63 = vpop.f32.mrf.mxu0  ;;  %v744_v0 = vpop.f32.mrf.mxu1  ;;  %1304 = vmatmul.mubr.bf16.gmra.mxu1 %v1007_v55  ;;  %v921_v9 = vmax.f32 %v611_v59, 0.0 }
  0xee   : > { %v1001_v3 = vmax.f32 %v743_v61, 0.0  ;;  %v615_v4 = vadd.f32 %v614_v63, %v2892_v53  ;;  %v745_v5 = vadd.f32 %v744_v0, %v2892_v53  ;;  %v923_v6 = vmax.f32 %v613_v60, 0.0 }
  0xef   : > { %v618_v7 = vpop.f32.mrf.mxu0  ;;  %v2455_v8 = vpop.f32.mrf.mxu1 }
  0xf0   : > { %v2929_v11 = vpack.c.bf16 %v1001_v3, %v998_v58  ;;  %v924_v12 = vmax.f32 %v615_v4, 0.0  ;;  %v1002_v13 = vmax.f32 %v745_v5, 0.0  ;;  %v790_v15 = vadd.f32 %v2455_v8, %v2925_v1 }
  0xf1   : > { %v620_v16 = vpop.f32.mrf.mxu0  ;;  %v781_v47 = vpop.f32.mrf.mxu1  ;;  %v1010_v21 = vpack.c.bf16 %v923_v6, %v920_v14  ;;  %v619_v27 = vadd.f32 %v618_v7, %v2888_v49 }
  0xf2   : > { %v1011_v18 = vpack.c.bf16 %v924_v12, %v921_v9  ;;  %v2932_v19 = vpack.c.bf16 %v1002_v13, %v999_v2  ;;  %v782_v20 = vadd.f32 %v781_v47, %v2925_v1  ;;  %v621_v24 = vadd.f32 %v620_v16, %v2892_v53 }
  0xf3   : > { %v622_v22 = vpop.f32.mrf.mxu0  ;;  %v2456_v23 = vpop.f32.mrf.mxu1  ;;  %v916_v28 = vmax.f32 %v790_v15, 0.0  ;;  %v926_v42 = vmax.f32 %v619_v27, 0.0 }
  0xf4   : > { %v623_v25 = vadd.f32 %v622_v22, %v2888_v49  ;;  %v793_v26 = vadd.f32 %v2456_v23, %v2925_v1  ;;  %1311 = vmatprep.mubr.bf16.mxu1 %v1011_v18  ;;  %v910_v31 = vmax.f32 %v782_v20, 0.0  ;;  %v927_v39 = vmax.f32 %v621_v24, 0.0 }
  0xf5   : > { %v624_v29 = vpop.f32.mrf.mxu0  ;;  %v784_v30 = vpop.f32.mrf.mxu1  ;;  %1312 = vmatmul.mubr.bf16.gmra.mxu1 %v1010_v21 }
  0xf6   : > { %v919_v32 = vmax.f32 %v793_v26, 0.0  ;;  %v625_v33 = vadd.f32 %v624_v29, %v2892_v53  ;;  %v785_v34 = vadd.f32 %v784_v30, %v2925_v1  ;;  %v929_v35 = vmax.f32 %v623_v25, 0.0 }
  0xf7   : > { %v628_v36 = vpop.f32.mrf.mxu0  ;;  %v2459_v37 = vpop.f32.mrf.mxu1 }
  0xf8   : > { %v930_v40 = vmax.f32 %v625_v33, 0.0  ;;  %v913_v41 = vmax.f32 %v785_v34, 0.0  ;;  %v1009_v43 = vpack.c.bf16 %v919_v32, %v916_v28  ;;  %v806_v48 = vadd.f32 %v2459_v37, %v2925_v1 }
  0xf9   : > { %v630_v50 = vpop.f32.mrf.mxu0  ;;  %v797_v51 = vpop.f32.mrf.mxu1  ;;  %v1013_v57 = vpack.c.bf16 %v929_v35, %v926_v42  ;;  %v629_v63 = vadd.f32 %v628_v36, %v2888_v49 }
  0xfa   : > { %v1014_v54 = vpack.c.bf16 %v930_v40, %v927_v39  ;;  %v1006_v55 = vpack.c.bf16 %v913_v41, %v910_v31  ;;  %v798_v56 = vadd.f32 %v797_v51, %v2925_v1  ;;  %v631_v60 = vadd.f32 %v630_v50, %v2892_v53 }
  0xfb   : > { %v632_v58 = vpop.f32.mrf.mxu0  ;;  %v2460_v59 = vpop.f32.mrf.mxu1  ;;  %v928_v0 = vmax.f32 %v806_v48, 0.0  ;;  %v932_v16 = vmax.f32 %v629_v63, 0.0 }
  0xfc   : > { %v633_v61 = vadd.f32 %v632_v58, %v2888_v49  ;;  %v809_v62 = vadd.f32 %v2460_v59, %v2925_v1  ;;  %1319 = vmatprep.mubr.bf16.mxu1 %v1014_v54  ;;  %2491 = vmatprep.mubr.msk.bf16.mxu0 %vm1210_vm2, %v1006_v55  ;;  %v922_v4 = vmax.f32 %v798_v56, 0.0  ;;  %v933_v13 = vmax.f32 %v631_v60, 0.0 }
  0xfd   : > { %v634_v2 = vpop.f32.mrf.mxu0  ;;  %v800_v3 = vpop.f32.mrf.mxu1  ;;  %1320 = vmatmul.mubr.bf16.gmra.mxu1 %v1013_v57  ;;  %2492 = vmatmul.mubr.msk.bf16.vlgmr.msra.gmra.mxu0 %vm1210_vm2, %v1009_v43 }
  0xfe   : > { %v931_v5 = vmax.f32 %v809_v62, 0.0  ;;  %v635_v6 = vadd.f32 %v634_v2, %v2892_v53  ;;  %v801_v7 = vadd.f32 %v800_v3, %v2925_v1  ;;  %v935_v8 = vmax.f32 %v633_v61, 0.0 }
  0xff   : > { %v638_v9 = vpop.f32.mrf.mxu0  ;;  %v2463_v12 = vpop.f32.mrf.mxu1 }
 0x100   : > { %v936_v14 = vmax.f32 %v635_v6, 0.0  ;;  %v925_v15 = vmax.f32 %v801_v7, 0.0  ;;  %v1015_v47 = vpack.c.bf16 %v931_v5, %v928_v0  ;;  %v822_v18 = vadd.f32 %v2463_v12, %v2925_v1 }
 0x101   : > { %v640_v20 = vpop.f32.mrf.mxu0  ;;  %v813_v21 = vpop.f32.mrf.mxu1  ;;  %v1016_v25 = vpack.c.bf16 %v935_v8, %v932_v16  ;;  %v639_v31 = vadd.f32 %v638_v9, %v2888_v49 }
 0x102   : > { %v1017_v22 = vpack.c.bf16 %v936_v14, %v933_v13  ;;  %v1012_v23 = vpack.c.bf16 %v925_v15, %v922_v4  ;;  %v814_v24 = vadd.f32 %v813_v21, %v2925_v1  ;;  %v641_v28 = vadd.f32 %v640_v20, %v2892_v53 }
 0x103   : > { %v642_v26 = vpop.f32.mrf.mxu0  ;;  %v2464_v27 = vpop.f32.mrf.mxu1  ;;  %v940_v32 = vmax.f32 %v822_v18, 0.0  ;;  %v938_v51 = vmax.f32 %v639_v31, 0.0 }
 0x104   : > { %v643_v29 = vadd.f32 %v642_v26, %v2888_v49  ;;  %v825_v30 = vadd.f32 %v2464_v27, %v2925_v1  ;;  %1327 = vmatprep.mubr.bf16.mxu1 %v1017_v22  ;;  %2495 = vmatprep.mubr.msk.bf16.mxu0 %vm1210_vm2, %v1012_v23  ;;  %v934_v35 = vmax.f32 %v814_v24, 0.0  ;;  %v939_v43 = vmax.f32 %v641_v28, 0.0 }
 0x105   : > { %v644_v33 = vpop.f32.mrf.mxu0  ;;  %v816_v34 = vpop.f32.mrf.mxu1  ;;  %1328 = vmatmul.mubr.bf16.gmra.mxu1 %v1016_v25  ;;  %2496 = vmatmul.mubr.msk.bf16.gmra.mxu0 %vm1210_vm2, %v1015_v47 }
 0x106   : > { %v943_v36 = vmax.f32 %v825_v30, 0.0  ;;  %v645_v37 = vadd.f32 %v644_v33, %v2892_v53  ;;  %v817_v39 = vadd.f32 %v816_v34, %v2925_v1  ;;  %v941_v40 = vmax.f32 %v643_v29, 0.0 }
 0x107   : > { %v648_v41 = vpop.f32.mrf.mxu0  ;;  %v2467_v42 = vpop.f32.mrf.mxu1 }
 0x108   : > { %v942_v48 = vmax.f32 %v645_v37, 0.0  ;;  %v937_v50 = vmax.f32 %v817_v39, 0.0  ;;  %v1021_v54 = vpack.c.bf16 %v943_v36, %v940_v32  ;;  %v838_v59 = vadd.f32 %v2467_v42, %v2925_v1 }
 0x109   : > { %v650_v55 = vpop.f32.mrf.mxu0  ;;  %v829_v56 = vpop.f32.mrf.mxu1  ;;  %v1019_v60 = vpack.c.bf16 %v941_v40, %v938_v51  ;;  %v649_v4 = vadd.f32 %v648_v41, %v2888_v49 }
 0x10a   : > { %v1020_v57 = vpack.c.bf16 %v942_v48, %v939_v43  ;;  %v1018_v58 = vpack.c.bf16 %v937_v50, %v934_v35  ;;  %v830_v62 = vadd.f32 %v829_v56, %v2925_v1  ;;  %v651_v0 = vadd.f32 %v650_v55, %v2892_v53 }
 0x10b   : > { %v652_v61 = vpop.f32.mrf.mxu0  ;;  %v2468_v63 = vpop.f32.mrf.mxu1  ;;  %v952_v7 = vmax.f32 %v838_v59, 0.0  ;;  %v944_v20 = vmax.f32 %v649_v4, 0.0 }
 0x10c   : > { %v653_v2 = vadd.f32 %v652_v61, %v2888_v49  ;;  %1335 = vmatprep.mubr.bf16.mxu1 %v1020_v57  ;;  %2499 = vmatprep.mubr.msk.bf16.mxu0 %vm1210_vm2, %v1018_v58  ;;  %v841_v3 = vadd.f32 %v2468_v63, %v2925_v1  ;;  %v946_v14 = vmax.f32 %v830_v62, 0.0  ;;  %v945_v47 = vmax.f32 %v651_v0, 0.0 }
 0x10d   : > { %v654_v5 = vpop.f32.mrf.mxu0  ;;  %1336 = vmatmul.mubr.bf16.gmra.mxu1 %v1019_v60  ;;  %2500 = vmatmul.mubr.msk.bf16.gmra.mxu0 %vm1210_vm2, %v1021_v54  ;;  %v832_v6 = vpop.f32.mrf.mxu1 }
 0x10e   : > { %v655_v8 = vadd.f32 %v654_v5, %v2892_v53  ;;  %v955_v9 = vmax.f32 %v841_v3, 0.0  ;;  %v833_v12 = vadd.f32 %v832_v6, %v2925_v1  ;;  %v947_v13 = vmax.f32 %v653_v2, 0.0 }
 0x10f   : > { %v658_v15 = vpop.f32.mrf.mxu0  ;;  %v2471_v16 = vpop.f32.mrf.mxu1 }
 0x110   : > { %v948_v18 = vmax.f32 %v655_v8, 0.0  ;;  %v949_v22 = vmax.f32 %v833_v12, 0.0  ;;  %v1027_v25 = vpack.c.bf16 %v955_v9, %v952_v7  ;;  %v854_v26 = vadd.f32 %v2471_v16, %v2925_v1 }
 0x111   : > { %v660_v21 = vpop.f32.mrf.mxu0  ;;  %v845_v23 = vpop.f32.mrf.mxu1  ;;  %v1022_v27 = vpack.c.bf16 %v947_v13, %v944_v20  ;;  %v659_v35 = vadd.f32 %v658_v15, %v2888_v49 }
 0x112   : > { %v1023_v24 = vpack.c.bf16 %v948_v18, %v945_v47  ;;  %v1024_v28 = vpack.c.bf16 %v949_v22, %v946_v14  ;;  %v846_v30 = vadd.f32 %v845_v23, %v2925_v1  ;;  %v661_v32 = vadd.f32 %v660_v21, %v2892_v53 }
 0x113   : > { %v662_v29 = vpop.f32.mrf.mxu0  ;;  %v2472_v31 = vpop.f32.mrf.mxu1  ;;  %v964_v40 = vmax.f32 %v854_v26, 0.0  ;;  %v950_v56 = vmax.f32 %v659_v35, 0.0 }
 0x114   : > { %v663_v33 = vadd.f32 %v662_v29, %v2888_v49  ;;  %1343 = vmatprep.mubr.bf16.mxu1 %v1023_v24  ;;  %v857_v34 = vadd.f32 %v2472_v31, %v2925_v1  ;;  %2503 = vmatprep.mubr.msk.bf16.mxu0 %vm1210_vm2, %v1024_v28  ;;  %v958_v50 = vmax.f32 %v846_v30, 0.0  ;;  %v951_v54 = vmax.f32 %v661_v32, 0.0 }
 0x115   : > { %v664_v36 = vpop.f32.mrf.mxu0  ;;  %1344 = vmatmul.mubr.bf16.gmra.mxu1 %v1022_v27  ;;  %v848_v37 = vpop.f32.mrf.mxu1  ;;  %2504 = vmatmul.mubr.msk.bf16.gmra.mxu0 %vm1210_vm2, %v1027_v25 }
 0x116   : > { %v665_v39 = vadd.f32 %v664_v36, %v2892_v53  ;;  %v967_v41 = vmax.f32 %v857_v34, 0.0  ;;  %v849_v42 = vadd.f32 %v848_v37, %v2925_v1  ;;  %v953_v43 = vmax.f32 %v663_v33, 0.0 }
 0x117   : > { %v668_v48 = vpop.f32.mrf.mxu0  ;;  %v2475_v51 = vpop.f32.mrf.mxu1 }
 0x118   : > { %v954_v55 = vmax.f32 %v665_v39, 0.0  ;;  %v961_v58 = vmax.f32 %v849_v42, 0.0  ;;  %v1033_v61 = vpack.c.bf16 %v967_v41, %v964_v40  ;;  %v870_v62 = vadd.f32 %v2475_v51, %v2925_v1 }
 0x119   : > { %v670_v57 = vpop.f32.mrf.mxu0  ;;  %v861_v59 = vpop.f32.mrf.mxu1  ;;  %v1025_v63 = vpack.c.bf16 %v953_v43, %v950_v56  ;;  %v669_v8 = vadd.f32 %v668_v48, %v2888_v49 }
 0x11a   : > { %v1026_v60 = vpack.c.bf16 %v954_v55, %v951_v54  ;;  %v1030_v2 = vpack.c.bf16 %v961_v58, %v958_v50  ;;  %v862_v3 = vadd.f32 %v861_v59, %v2925_v1  ;;  %v671_v5 = vadd.f32 %v670_v57, %v2892_v53 }
 0x11b   : > { %v672_v0 = vpop.f32.mrf.mxu0  ;;  %v2476_v4 = vpop.f32.mrf.mxu1  ;;  %v976_v14 = vmax.f32 %v870_v62, 0.0  ;;  %v956_v24 = vmax.f32 %v669_v8, 0.0 }
 0x11c   : > { %v673_v6 = vadd.f32 %v672_v0, %v2888_v49  ;;  %1351 = vmatprep.mubr.bf16.mxu1 %v1026_v60  ;;  %v873_v7 = vadd.f32 %v2476_v4, %v2925_v1  ;;  %2507 = vmatprep.mubr.msk.bf16.mxu0 %vm1210_vm2, %v1030_v2  ;;  %v970_v20 = vmax.f32 %v862_v3, 0.0  ;;  %v957_v22 = vmax.f32 %v671_v5, 0.0 }
 0x11d   : > { %v674_v9 = vpop.f32.mrf.mxu0  ;;  %1352 = vmatmul.mubr.bf16.gmra.mxu1 %v1025_v63  ;;  %v864_v12 = vpop.f32.mrf.mxu1  ;;  %2508 = vmatmul.mubr.msk.bf16.gmra.mxu0 %vm1210_vm2, %v1033_v61 }
 0x11e   : > { %v675_v13 = vadd.f32 %v674_v9, %v2892_v53  ;;  %v979_v15 = vmax.f32 %v873_v7, 0.0  ;;  %v865_v16 = vadd.f32 %v864_v12, %v2925_v1  ;;  %v959_v47 = vmax.f32 %v673_v6, 0.0 }
 0x11f   : > { %v678_v18 = vpop.f32.mrf.mxu0  ;;  %v2479_v21 = vpop.f32.mrf.mxu1 }
 0x120   : > { %v960_v23 = vmax.f32 %v675_v13, 0.0  ;;  %v973_v26 = vmax.f32 %v865_v16, 0.0  ;;  %v1039_v29 = vpack.c.bf16 %v979_v15, %v976_v14  ;;  %v886_v30 = vadd.f32 %v2479_v21, %v2925_v1 }
 0x121   : > { %v680_v25 = vpop.f32.mrf.mxu0  ;;  %v877_v27 = vpop.f32.mrf.mxu1  ;;  %v1028_v31 = vpack.c.bf16 %v959_v47, %v956_v24  ;;  %v679_v40 = vadd.f32 %v678_v18, %v2888_v49 }
 0x122   : > { %v1029_v28 = vpack.c.bf16 %v960_v23, %v957_v22  ;;  %v1036_v33 = vpack.c.bf16 %v973_v26, %v970_v20  ;;  %v878_v34 = vadd.f32 %v877_v27, %v2925_v1  ;;  %v681_v36 = vadd.f32 %v680_v25, %v2892_v53  ;;  %v2637_v22 = vld [vmem:[%s3213_s5 + $0x30] ss:$0 sps:$4 sm:$0x33]  }
 0x123   : > { %v682_v32 = vpop.f32.mrf.mxu0  ;;  %v2480_v35 = vpop.f32.mrf.mxu1  ;;  %v988_v48 = vmax.f32 %v886_v30, 0.0  ;;  %v962_v60 = vmax.f32 %v679_v40, 0.0  ;;  %2574 = vmatprep.subr.msk.bf16.mxu0 %vm1741_vm3, %v2637_v22 }
 0x124   : > { %v683_v37 = vadd.f32 %v682_v32, %v2888_v49  ;;  %1359 = vmatprep.mubr.bf16.mxu1 %v1029_v28  ;;  %v889_v39 = vadd.f32 %v2480_v35, %v2925_v1  ;;  %2511 = vmatprep.mubr.msk.bf16.mxu0 %vm1210_vm2, %v1036_v33  ;;  %v982_v56 = vmax.f32 %v878_v34, 0.0  ;;  %v963_v58 = vmax.f32 %v681_v36, 0.0 }
 0x125   : > { %v684_v41 = vpop.f32.mrf.mxu0  ;;  %1360 = vmatmul.mubr.bf16.gmra.mxu1 %v1028_v31  ;;  %v880_v42 = vpop.f32.mrf.mxu1  ;;  %2512 = vmatmul.mubr.msk.bf16.gmra.mxu0 %vm1210_vm2, %v1039_v29  ;;  %v1743_v31 = vsel %vm1741_vm3, %v2637_v22, 0 }
 0x126   : > { %v685_v43 = vadd.f32 %v684_v41, %v2892_v53  ;;  %v991_v50 = vmax.f32 %v889_v39, 0.0  ;;  %v881_v51 = vadd.f32 %v880_v42, %v2925_v1  ;;  %v965_v54 = vmax.f32 %v683_v37, 0.0  ;;  %2524 = vmatpush3.bf16.msra.mxu0 %v1743_v31 }
 0x127   : > { %v688_v55 = vpop.f32.mrf.mxu0  ;;  %v2483_v57 = vpop.f32.mrf.mxu1 }
 0x128   : > { %v966_v59 = vmax.f32 %v685_v43, 0.0  ;;  %v985_v62 = vmax.f32 %v881_v51, 0.0  ;;  %v1045_v2 = vpack.c.bf16 %v991_v50, %v988_v48  ;;  %v902_v3 = vadd.f32 %v2483_v57, %v2925_v1  ;;  %v2639_v43 = vld [vmem:[%s3213_s5 + $0x20] sm:$0xff]  }
 0x129   : > { %v690_v61 = vpop.f32.mrf.mxu0  ;;  %v893_v63 = vpop.f32.mrf.mxu1  ;;  %v1031_v4 = vpack.c.bf16 %v965_v54, %v962_v60  ;;  %v689_v14 = vadd.f32 %v688_v55, %v2888_v49 }
 0x12a   : > { %v1032_v0 = vpack.c.bf16 %v966_v59, %v963_v58  ;;  %v1042_v6 = vpack.c.bf16 %v985_v62, %v982_v56  ;;  %v894_v7 = vadd.f32 %v893_v63, %v2925_v1  ;;  %v691_v9 = vadd.f32 %v690_v61, %v2892_v53  ;;  %v2640_v58 = vld [vmem:[%s3213_s5 + $0x18] sm:$0xff]  }
 0x12b   : > { %v692_v5 = vpop.f32.mrf.mxu0  ;;  %v2484_v8 = vpop.f32.mrf.mxu1  ;;  %v1000_v18 = vmax.f32 %v902_v3, 0.0  ;;  %v968_v28 = vmax.f32 %v689_v14, 0.0  ;;  %v2641_v3 = vld [vmem:[%s3213_s5 + $0x10] sm:$0xff]  }
 0x12c   : > { %v693_v12 = vadd.f32 %v692_v5, %v2888_v49  ;;  %1367 = vmatprep.mubr.bf16.mxu1 %v1032_v0  ;;  %v905_v13 = vadd.f32 %v2484_v8, %v2925_v1  ;;  %2515 = vmatprep.mubr.msk.bf16.mxu0 %vm1210_vm2, %v1042_v6  ;;  %v994_v25 = vmax.f32 %v894_v7, 0.0  ;;  %v969_v26 = vmax.f32 %v691_v9, 0.0  ;;  %v2642_v9 = vld [vmem:[%s3213_s5 + $0x8] sm:$0xff]  }
 0x12d   : > { %v694_v15 = vpop.f32.mrf.mxu0  ;;  %1368 = vmatmul.mubr.bf16.gmra.mxu1 %v1031_v4  ;;  %v896_v16 = vpop.f32.mrf.mxu1  ;;  %2516 = vmatmul.mubr.msk.bf16.gmra.mxu0 %vm1210_vm2, %v1045_v2 }
 0x12e   : > { %v695_v47 = vadd.f32 %v694_v15, %v2892_v53  ;;  %v1003_v20 = vmax.f32 %v905_v13, 0.0  ;;  %v897_v21 = vadd.f32 %v896_v16, %v2925_v1  ;;  %v971_v23 = vmax.f32 %v693_v12, 0.0  ;;  %v2638_v1 = vld [vmem:[%s3213_s5 + $0x28] sm:$0xff]  }
 0x12f   : > { %v698_v24 = vpop.f32.mrf.mxu0  ;;  %2525 = vmatprep.subr.bf16.mxu0 %v2638_v1 }
 0x130   : > { %v972_v27 = vmax.f32 %v695_v47, 0.0  ;;  %v997_v30 = vmax.f32 %v897_v21, 0.0  ;;  %v1051_v33 = vpack.c.bf16 %v1003_v20, %v1000_v18  ;;  %v1034_v34 = vpack.c.bf16 %v971_v23, %v968_v28  ;;  %2526 = vmatpush3.bf16.msra.mxu0 %v2638_v1 }
 0x131   : > { %v700_v29 = vpop.f32.mrf.mxu0  ;;  %v699_v40 = vadd.f32 %v698_v24, %v2888_v49  ;;  %2527 = vmatprep.subr.bf16.mxu0 %v2639_v43 }
 0x132   : > { %v1035_v32 = vpack.c.bf16 %v972_v27, %v969_v26  ;;  %v1048_v36 = vpack.c.bf16 %v997_v30, %v994_v25  ;;  %v701_v37 = vadd.f32 %v700_v29, %v2892_v53 }
 0x133   : > { %v702_v35 = vpop.f32.mrf.mxu0  ;;  %v974_v55 = vmax.f32 %v699_v40, 0.0 }
 0x134   : > { %v703_v39 = vadd.f32 %v702_v35, %v2888_v49  ;;  %1375 = vmatprep.mubr.bf16.mxu1 %v1035_v32  ;;  %2519 = vmatprep.mubr.msk.bf16.mxu0 %vm1210_vm2, %v1048_v36  ;;  %v975_v51 = vmax.f32 %v701_v37, 0.0 }
 0x135   : > { %v704_v41 = vpop.f32.mrf.mxu0  ;;  %1376 = vmatmul.mubr.bf16.gmra.mxu1 %v1034_v34  ;;  %2520 = vmatmul.mubr.msk.bf16.gmra.mxu0 %vm1210_vm2, %v1051_v33 }
 0x136   : > { %v705_v42 = vadd.f32 %v704_v41, %v2892_v53  ;;  %v977_v48 = vmax.f32 %v703_v39, 0.0  ;;  %2528 = vmatpush3.bf16.msra.mxu0 %v2639_v43 }
 0x137   : > { %v708_v50 = vpop.f32.mrf.mxu0  ;;  %2529 = vmatprep.subr.bf16.mxu0 %v2640_v58 }
 0x138   : > { %v978_v54 = vmax.f32 %v705_v42, 0.0  ;;  %v1037_v59 = vpack.c.bf16 %v977_v48, %v974_v55  ;;  %v709_v63 = vadd.f32 %v708_v50, %v2888_v49 }
 0x139   : > { %v710_v56 = vpop.f32.mrf.mxu0 }
 0x13a   : > { %v1038_v57 = vpack.c.bf16 %v978_v54, %v975_v51  ;;  %v711_v61 = vadd.f32 %v710_v56, %v2892_v53  ;;  %2530 = vmatpush3.bf16.msra.mxu0 %v2640_v58  ;;  %v980_v7 = vmax.f32 %v709_v63, 0.0 }
 0x13b   : > { %v712_v60 = vpop.f32.mrf.mxu0  ;;  %2531 = vmatprep.subr.bf16.mxu0 %v2641_v3 }
 0x13c   : > { %v713_v62 = vadd.f32 %v712_v60, %v2888_v49  ;;  %1383 = vmatprep.mubr.bf16.mxu1 %v1038_v57  ;;  %v981_v5 = vmax.f32 %v711_v61, 0.0 }
 0x13d   : > { %v714_v0 = vpop.f32.mrf.mxu0  ;;  %1384 = vmatmul.mubr.bf16.gmra.mxu1 %v1037_v59 }
 0x13e   : > { %v715_v2 = vadd.f32 %v714_v0, %v2892_v53  ;;  %v983_v4 = vmax.f32 %v713_v62, 0.0  ;;  %2532 = vmatpush3.bf16.msra.mxu0 %v2641_v3  ;;  %v2643_v53 = vld [vmem:[%s3213_s5] sm:$0xff]  }
 0x13f   : > { %2533 = vmatprep.subr.bf16.mxu0 %v2642_v9 }
 0x140   : > { %v984_v6 = vmax.f32 %v715_v2, 0.0  ;;  %v1040_v49 = vpack.c.bf16 %v983_v4, %v980_v7 }
 0x142   : > { %v1041_v8 = vpack.c.bf16 %v984_v6, %v981_v5  ;;  %2534 = vmatpush3.bf16.msra.mxu0 %v2642_v9 }
 0x143   : > { %2535 = vmatprep.subr.bf16.mxu0 %v2643_v53 }
 0x144   : > { %1391 = vmatprep.mubr.bf16.mxu1 %v1041_v8 }
 0x145   : > { %1392 = vmatmul.mubr.bf16.gmra.mxu1 %v1040_v49 }
 0x146   : > { %1399 = vmatprep.mubr.bf16.mxu1 %v2904_v17  ;;  %2536 = vmatpush3.bf16.msra.mxu0 %v2643_v53 }
 0x14d   : > { %1400 = vmatmul.mubr.bf16.gmra.mxu1 %v2901_v10 }
 0x14e   : > { %1407 = vmatprep.mubr.bf16.mxu1 %v2917_v52 }
 0x155   : > { %1408 = vmatmul.mubr.bf16.gmra.mxu1 %v2913_v38 }
 0x156   : > { %1415 = vmatprep.mubr.bf16.mxu1 %v2932_v19 }
 0x15d   : > { %1416 = vmatmul.mubr.bf16.gmra.mxu1 %v2929_v11  ;;  %v3051_v11 = vld [vmem:[%s3212_s4] ss:$0 sm:$0xff] }
 0x1a5   : > { %v2293_v12 = vpop.f32.mrf.mxu1 }
 0x1a7   : > { %v2294_v13 = vpop.f32.mrf.mxu1 }
 0x1a8   : > { %v2295_v23 = vadd.f32 %v2294_v13, %v2293_v12 }
 0x1a9   : > { %v2296_v17 = vpop.f32.mrf.mxu1 }
 0x1aa   : > { %v1298_v28 = vadd.f32 %v2295_v23, %v3051_v11 }
 0x1ab   : > { %v2297_v14 = vpop.f32.mrf.mxu1 }
 0x1ac   : > { %v2298_v25 = vadd.f32 %v2297_v14, %v2296_v17 }
 0x1ad   : > { %v2299_v15 = vpop.f32.mrf.mxu1 }
 0x1ae   : > { %v1301_v34 = vadd.f32 %v2298_v25, %v3051_v11 }
 0x1af   : > { %v2300_v16 = vpop.f32.mrf.mxu1 }
 0x1b0   : > { %v2301_v24 = vadd.f32 %v2300_v16, %v2299_v15 }
 0x1b1   : > { %v2302_v47 = vpop.f32.mrf.mxu1 }
 0x1b2   : > { %v1306_v30 = vadd.f32 %v2301_v24, %v3051_v11 }
 0x1b3   : > { %v2303_v18 = vpop.f32.mrf.mxu1 }
 0x1b4   : > { %v2304_v52 = vadd.f32 %v2303_v18, %v2302_v47 }
 0x1b5   : > { %v2305_v20 = vpop.f32.mrf.mxu1 }
 0x1b6   : > { %v1309_v29 = vadd.f32 %v2304_v52, %v3051_v11 }
 0x1b7   : > { %v2306_v21 = vpop.f32.mrf.mxu1 }
 0x1b8   : > { %v2307_v39 = vadd.f32 %v2306_v21, %v2305_v20 }
 0x1b9   : > { %v2308_v22 = vpop.f32.mrf.mxu1 }
 0x1ba   : > { %v1314_v60 = vadd.f32 %v2307_v39, %v3051_v11 }
 0x1bb   : > { %v2309_v10 = vpop.f32.mrf.mxu1 }
 0x1bc   : > { %v2310_v51 = vadd.f32 %v2309_v10, %v2308_v22 }
 0x1bd   : > { %v2311_v38 = vpop.f32.mrf.mxu1  ;;  %v2493_v19 = vpop.f32.mrf.mxu0 }
 0x1be   : > { %v1467_v35 = vadd.f32 %v2493_v19, %v1306_v30  ;;  %v1317_v5 = vadd.f32 %v2310_v51, %v3051_v11 }
 0x1bf   : > { %v2312_v26 = vpop.f32.mrf.mxu1  ;;  %v1458_v27 = vpop.f32.mrf.mxu0 }
 0x1c0   : > { %v1459_v33 = vadd.f32 %v1458_v27, %v1298_v28  ;;  %v2313_v42 = vadd.f32 %v2312_v26, %v2311_v38  ;;  %v1587_v56 = vmax.f32 %v1467_v35, 0.0 }
 0x1c1   : > { %v2314_v31 = vpop.f32.mrf.mxu1  ;;  %v2494_v32 = vpop.f32.mrf.mxu0 }
 0x1c2   : > { %v1470_v1 = vadd.f32 %v2494_v32, %v1309_v29  ;;  %v1585_v54 = vmax.f32 %v1459_v33, 0.0  ;;  %v1322_v63 = vadd.f32 %v2313_v42, %v3051_v11 }
 0x1c3   : > { %v2315_v36 = vpop.f32.mrf.mxu1  ;;  %v1461_v37 = vpop.f32.mrf.mxu0 }
 0x1c4   : > { %v2316_v40 = vadd.f32 %v2315_v36, %v2314_v31  ;;  %v1462_v41 = vadd.f32 %v1461_v37, %v1301_v34  ;;  %v1588_v43 = vmax.f32 %v1470_v1, 0.0 }
 0x1c5   : > { %v2317_v48 = vpop.f32.mrf.mxu1  ;;  %v2497_v50 = vpop.f32.mrf.mxu0 }
 0x1c6   : > { %v1586_v55 = vmax.f32 %v1462_v41, 0.0  ;;  %v1325_v61 = vadd.f32 %v2316_v40, %v3051_v11  ;;  %v1618_v62 = vpack.c.bf16 %v1588_v43, %v1587_v56  ;;  %v1483_v6 = vadd.f32 %v2497_v50, %v1322_v63 }
 0x1c7   : > { %v2318_v57 = vpop.f32.mrf.mxu1  ;;  %v1474_v58 = vpop.f32.mrf.mxu0 }
 0x1c8   : > { %v1617_v59 = vpack.c.bf16 %v1586_v55, %v1585_v54  ;;  %v1475_v3 = vadd.f32 %v1474_v58, %v1314_v60  ;;  %v2319_v9 = vadd.f32 %v2318_v57, %v2317_v48  ;;  %v1591_v16 = vmax.f32 %v1483_v6, 0.0 }
 0x1c9   : > { %v2320_v0 = vpop.f32.mrf.mxu1  ;;  %v2498_v2 = vpop.f32.mrf.mxu0 }
 0x1ca   : > { %v1486_v4 = vadd.f32 %v2498_v2, %v1325_v61  ;;  %2537 = vmatprep.mubr.msk.bf16.mxu0 %vm1692_vm4, %v1617_v59  ;;  %v1589_v17 = vmax.f32 %v1475_v3, 0.0  ;;  %v1330_v22 = vadd.f32 %v2319_v9, %v3051_v11 }
 0x1cb   : > { %v2321_v7 = vpop.f32.mrf.mxu1  ;;  %v1477_v8 = vpop.f32.mrf.mxu0  ;;  %2538 = vmatmul.mubr.msk.bf16.vlgmr.msra.gmra.mxu0 %vm1692_vm4, %v1618_v62 }
 0x1cc   : > { %v1478_v49 = vadd.f32 %v1477_v8, %v1317_v5  ;;  %v1592_v53 = vmax.f32 %v1486_v4, 0.0  ;;  %v2322_v14 = vadd.f32 %v2321_v7, %v2320_v0 }
 0x1cd   : > { %v2323_v12 = vpop.f32.mrf.mxu1  ;;  %v2501_v13 = vpop.f32.mrf.mxu0 }
 0x1ce   : > { %v1590_v15 = vmax.f32 %v1478_v49, 0.0  ;;  %v1620_v10 = vpack.c.bf16 %v1592_v53, %v1591_v16  ;;  %v1333_v19 = vadd.f32 %v2322_v14, %v3051_v11 }
 0x1cf   : > { %v2324_v47 = vpop.f32.mrf.mxu1  ;;  %v1490_v18 = vpop.f32.mrf.mxu0 }
 0x1d0   : > { %v1619_v20 = vpack.c.bf16 %v1590_v15, %v1589_v17  ;;  %v2325_v21 = vadd.f32 %v2324_v47, %v2323_v12  ;;  %v1491_v38 = vadd.f32 %v1490_v18, %v1330_v22 }
 0x1d1   : > { %v2326_v23 = vpop.f32.mrf.mxu1  ;;  %v2502_v52 = vpop.f32.mrf.mxu0 }
 0x1d2   : > { %v1338_v24 = vadd.f32 %v2325_v21, %v3051_v11  ;;  %2541 = vmatprep.mubr.msk.bf16.mxu0 %vm1692_vm4, %v1619_v20  ;;  %v1593_v31 = vmax.f32 %v1491_v38, 0.0 }
 0x1d3   : > { %v2327_v25 = vpop.f32.mrf.mxu1  ;;  %v1493_v26 = vpop.f32.mrf.mxu0  ;;  %2542 = vmatmul.mubr.msk.bf16.gmra.mxu0 %vm1692_vm4, %v1620_v10 }
 0x1d4   : > { %v2328_v27 = vadd.f32 %v2327_v25, %v2326_v23  ;;  %v1494_v28 = vadd.f32 %v1493_v26, %v1333_v19  ;;  %v1499_v30 = vadd.f32 %v2501_v13, %v1338_v24 }
 0x1d5   : > { %v2329_v29 = vpop.f32.mrf.mxu1  ;;  %v2505_v1 = vpop.f32.mrf.mxu0 }
 0x1d6   : > { %v1341_v32 = vadd.f32 %v2328_v27, %v3051_v11  ;;  %v1594_v33 = vmax.f32 %v1494_v28, 0.0  ;;  %v1595_v41 = vmax.f32 %v1499_v30, 0.0 }
 0x1d7   : > { %v2330_v34 = vpop.f32.mrf.mxu1  ;;  %v1506_v39 = vpop.f32.mrf.mxu0 }
 0x1d8   : > { %v1502_v35 = vadd.f32 %v2502_v52, %v1341_v32  ;;  %v1621_v36 = vpack.c.bf16 %v1594_v33, %v1593_v31  ;;  %v2331_v37 = vadd.f32 %v2330_v34, %v2329_v29 }
 0x1d9   : > { %v2332_v40 = vpop.f32.mrf.mxu1  ;;  %v2506_v48 = vpop.f32.mrf.mxu0 }
 0x1da   : > { %v1596_v42 = vmax.f32 %v1502_v35, 0.0  ;;  %2545 = vmatprep.mubr.msk.bf16.mxu0 %vm1692_vm4, %v1621_v36  ;;  %v1346_v43 = vadd.f32 %v2331_v37, %v3051_v11 }
 0x1db   : > { %v2333_v50 = vpop.f32.mrf.mxu1  ;;  %v1509_v56 = vpop.f32.mrf.mxu0 }
 0x1dc   : > { %v1622_v51 = vpack.c.bf16 %v1596_v42, %v1595_v41  ;;  %v2334_v54 = vadd.f32 %v2333_v50, %v2332_v40  ;;  %v1507_v57 = vadd.f32 %v1506_v39, %v1346_v43 }
 0x1dd   : > { %v2335_v55 = vpop.f32.mrf.mxu1  ;;  %v2509_v63 = vpop.f32.mrf.mxu0 }
 0x1de   : > { %2546 = vmatmul.mubr.msk.bf16.gmra.mxu0 %vm1692_vm4, %v1622_v51  ;;  %v1349_v58 = vadd.f32 %v2334_v54, %v3051_v11  ;;  %v1597_v0 = vmax.f32 %v1507_v57, 0.0 }
 0x1df   : > { %v2336_v59 = vpop.f32.mrf.mxu1  ;;  %v1522_v8 = vpop.f32.mrf.mxu0 }
 0x1e0   : > { %v2337_v60 = vadd.f32 %v2336_v59, %v2335_v55  ;;  %v1510_v61 = vadd.f32 %v1509_v56, %v1349_v58 }
 0x1e1   : > { %v2338_v62 = vpop.f32.mrf.mxu1  ;;  %v2510_v14 = vpop.f32.mrf.mxu0 }
 0x1e2   : > { %v1354_v2 = vadd.f32 %v2337_v60, %v3051_v11  ;;  %v1598_v3 = vmax.f32 %v1510_v61, 0.0 }
 0x1e3   : > { %v2339_v4 = vpop.f32.mrf.mxu1  ;;  %v1525_v10 = vpop.f32.mrf.mxu0 }
 0x1e4   : > { %v1623_v5 = vpack.c.bf16 %v1598_v3, %v1597_v0  ;;  %v2340_v6 = vadd.f32 %v2339_v4, %v2338_v62  ;;  %v1515_v9 = vadd.f32 %v2505_v1, %v1354_v2 }
 0x1e5   : > { %v2341_v7 = vpop.f32.mrf.mxu1  ;;  %v2513_v26 = vpop.f32.mrf.mxu0 }
 0x1e6   : > { %v1357_v49 = vadd.f32 %v2340_v6, %v3051_v11  ;;  %2549 = vmatprep.mubr.msk.bf16.mxu0 %vm1692_vm4, %v1623_v5  ;;  %v1599_v15 = vmax.f32 %v1515_v9, 0.0 }
 0x1e7   : > { %v2342_v53 = vpop.f32.mrf.mxu1  ;;  %v1538_v1 = vpop.f32.mrf.mxu0 }
 0x1e8   : > { %v1518_v12 = vadd.f32 %v2506_v48, %v1357_v49  ;;  %v2343_v13 = vadd.f32 %v2342_v53, %v2341_v7 }
 0x1e9   : > { %v2344_v17 = vpop.f32.mrf.mxu1  ;;  %v2514_v41 = vpop.f32.mrf.mxu0 }
 0x1ea   : > { %v1600_v16 = vmax.f32 %v1518_v12, 0.0  ;;  %v1362_v47 = vadd.f32 %v2343_v13, %v3051_v11 }
 0x1eb   : > { %v2345_v18 = vpop.f32.mrf.mxu1  ;;  %v1541_v56 = vpop.f32.mrf.mxu0 }
 0x1ec   : > { %v1624_v20 = vpack.c.bf16 %v1600_v16, %v1599_v15  ;;  %v2346_v21 = vadd.f32 %v2345_v18, %v2344_v17  ;;  %v1523_v23 = vadd.f32 %v1522_v8, %v1362_v47 }
 0x1ed   : > { %v2347_v22 = vpop.f32.mrf.mxu1 }
 0x1ee   : > { %2550 = vmatmul.mubr.msk.bf16.gmra.mxu0 %vm1692_vm4, %v1624_v20  ;;  %v1365_v52 = vadd.f32 %v2346_v21, %v3051_v11  ;;  %v1601_v27 = vmax.f32 %v1523_v23, 0.0 }
 0x1ef   : > { %v2348_v24 = vpop.f32.mrf.mxu1 }
 0x1f0   : > { %v2349_v38 = vadd.f32 %v2348_v24, %v2347_v22  ;;  %v1526_v19 = vadd.f32 %v1525_v10, %v1365_v52 }
 0x1f1   : > { %v2350_v25 = vpop.f32.mrf.mxu1 }
 0x1f2   : > { %v1370_v28 = vadd.f32 %v2349_v38, %v3051_v11  ;;  %v1602_v29 = vmax.f32 %v1526_v19, 0.0 }
 0x1f3   : > { %v2351_v30 = vpop.f32.mrf.mxu1 }
 0x1f4   : > { %v1625_v31 = vpack.c.bf16 %v1602_v29, %v1601_v27  ;;  %v2352_v32 = vadd.f32 %v2351_v30, %v2350_v25  ;;  %v1531_v34 = vadd.f32 %v2509_v63, %v1370_v28  ;;  %v2517_v63 = vpop.f32.mrf.mxu0 }
 0x1f5   : > { %v2353_v33 = vpop.f32.mrf.mxu1 }
 0x1f6   : > { %v1373_v35 = vadd.f32 %v2352_v32, %v3051_v11  ;;  %2553 = vmatprep.mubr.msk.bf16.mxu0 %vm1692_vm4, %v1625_v31  ;;  %v1603_v42 = vmax.f32 %v1531_v34, 0.0  ;;  %v1554_v8 = vpop.f32.mrf.mxu0 }
 0x1f7   : > { %v2354_v36 = vpop.f32.mrf.mxu1 }
 0x1f8   : > { %v1534_v37 = vadd.f32 %v2510_v14, %v1373_v35  ;;  %v2355_v39 = vadd.f32 %v2354_v36, %v2353_v33  ;;  %v2518_v14 = vpop.f32.mrf.mxu0 }
 0x1f9   : > { %v2356_v40 = vpop.f32.mrf.mxu1 }
 0x1fa   : > { %v1604_v43 = vmax.f32 %v1534_v37, 0.0  ;;  %v1378_v48 = vadd.f32 %v2355_v39, %v3051_v11  ;;  %v1557_v10 = vpop.f32.mrf.mxu0 }
 0x1fb   : > { %v2357_v50 = vpop.f32.mrf.mxu1 }
 0x1fc   : > { %v1626_v51 = vpack.c.bf16 %v1604_v43, %v1603_v42  ;;  %v2358_v54 = vadd.f32 %v2357_v50, %v2356_v40  ;;  %v1539_v57 = vadd.f32 %v1538_v1, %v1378_v48  ;;  %v2521_v30 = vpop.f32.mrf.mxu0 }
 0x1fd   : > { %v2359_v55 = vpop.f32.mrf.mxu1 }
 0x1fe   : > { %2554 = vmatmul.mubr.msk.bf16.gmra.mxu0 %vm1692_vm4, %v1626_v51  ;;  %v1381_v58 = vadd.f32 %v2358_v54, %v3051_v11  ;;  %v1605_v0 = vmax.f32 %v1539_v57, 0.0  ;;  %v1570_v35 = vpop.f32.mrf.mxu0 }
 0x1ff   : > { %v2360_v59 = vpop.f32.mrf.mxu1 }
 0x200   : > { %v2361_v60 = vadd.f32 %v2360_v59, %v2359_v55  ;;  %v1542_v61 = vadd.f32 %v1541_v56, %v1381_v58  ;;  %v2522_v48 = vpop.f32.mrf.mxu0 }
 0x201   : > { %v2362_v62 = vpop.f32.mrf.mxu1 }
 0x202   : > { %v1386_v2 = vadd.f32 %v2361_v60, %v3051_v11  ;;  %v1606_v3 = vmax.f32 %v1542_v61, 0.0  ;;  %v1573_v58 = vpop.f32.mrf.mxu0 }
 0x203   : > { %v2363_v4 = vpop.f32.mrf.mxu1 }
 0x204   : > { %v1627_v5 = vpack.c.bf16 %v1606_v3, %v1605_v0  ;;  %v2364_v6 = vadd.f32 %v2363_v4, %v2362_v62  ;;  %v1547_v9 = vadd.f32 %v2513_v26, %v1386_v2 }
 0x205   : > { %v2365_v7 = vpop.f32.mrf.mxu1 }
 0x206   : > { %v1389_v49 = vadd.f32 %v2364_v6, %v3051_v11  ;;  %2557 = vmatprep.mubr.msk.bf16.mxu0 %vm1692_vm4, %v1627_v5  ;;  %v1607_v15 = vmax.f32 %v1547_v9, 0.0 }
 0x207   : > { %v2366_v53 = vpop.f32.mrf.mxu1 }
 0x208   : > { %v1550_v12 = vadd.f32 %v2514_v41, %v1389_v49  ;;  %v2367_v13 = vadd.f32 %v2366_v53, %v2365_v7 }
 0x209   : > { %v2368_v17 = vpop.f32.mrf.mxu1 }
 0x20a   : > { %v1608_v16 = vmax.f32 %v1550_v12, 0.0  ;;  %v1394_v47 = vadd.f32 %v2367_v13, %v3051_v11  ;;  %v3104_v13 = vld [vmem:[%s3214_s6] ss:$0 sm:$0xff] }
 0x20b   : > { %v2369_v18 = vpop.f32.mrf.mxu1 }
 0x20c   : > { %v1628_v20 = vpack.c.bf16 %v1608_v16, %v1607_v15  ;;  %v2370_v21 = vadd.f32 %v2369_v18, %v2368_v17  ;;  %v1555_v23 = vadd.f32 %v1554_v8, %v1394_v47 }
 0x20d   : > { %v2371_v22 = vpop.f32.mrf.mxu1 }
 0x20e   : > { %2558 = vmatmul.mubr.msk.bf16.gmra.mxu0 %vm1692_vm4, %v1628_v20  ;;  %v1397_v52 = vadd.f32 %v2370_v21, %v3051_v11  ;;  %v1609_v26 = vmax.f32 %v1555_v23, 0.0 }
 0x20f   : > { %v2372_v24 = vpop.f32.mrf.mxu1 }
 0x210   : > { %v2373_v38 = vadd.f32 %v2372_v24, %v2371_v22  ;;  %v1558_v19 = vadd.f32 %v1557_v10, %v1397_v52 }
 0x211   : > { %v2374_v25 = vpop.f32.mrf.mxu1 }
 0x212   : > { %v1402_v27 = vadd.f32 %v2373_v38, %v3051_v11  ;;  %v1610_v28 = vmax.f32 %v1558_v19, 0.0 }
 0x213   : > { %v2375_v29 = vpop.f32.mrf.mxu1 }
 0x214   : > { %v1629_v31 = vpack.c.bf16 %v1610_v28, %v1609_v26  ;;  %v2376_v32 = vadd.f32 %v2375_v29, %v2374_v25  ;;  %v1563_v1 = vadd.f32 %v2517_v63, %v1402_v27 }
 0x215   : > { %v2377_v33 = vpop.f32.mrf.mxu1 }
 0x216   : > { %v1405_v34 = vadd.f32 %v2376_v32, %v3051_v11  ;;  %2561 = vmatprep.mubr.msk.bf16.mxu0 %vm1692_vm4, %v1629_v31  ;;  %v1611_v41 = vmax.f32 %v1563_v1, 0.0 }
 0x217   : > { %v2378_v36 = vpop.f32.mrf.mxu1 }
 0x218   : > { %v1566_v37 = vadd.f32 %v2518_v14, %v1405_v34  ;;  %v2379_v39 = vadd.f32 %v2378_v36, %v2377_v33 }
 0x219   : > { %v2380_v40 = vpop.f32.mrf.mxu1 }
 0x21a   : > { %v1612_v42 = vmax.f32 %v1566_v37, 0.0  ;;  %v1410_v43 = vadd.f32 %v2379_v39, %v3051_v11 }
 0x21b   : > { %v2381_v50 = vpop.f32.mrf.mxu1 }
 0x21c   : > { %v1630_v51 = vpack.c.bf16 %v1612_v42, %v1611_v41  ;;  %v2382_v54 = vadd.f32 %v2381_v50, %v2380_v40  ;;  %v1571_v56 = vadd.f32 %v1570_v35, %v1410_v43  ;;  %v3131_v41 = vld [vmem:[%s3215_s7] sm:$0x1] }
 0x21d   : > { %v2383_v55 = vpop.f32.mrf.mxu1  ;;  %2447 = vmatprep.mubr.msk.bf16.mxu1 %vm1965_vm5, %v3131_v41 }
 0x21e   : > { %v1413_v57 = vadd.f32 %v2382_v54, %v3051_v11  ;;  %2562 = vmatmul.mubr.msk.bf16.gmra.mxu0 %vm1692_vm4, %v1630_v51  ;;  %v1613_v63 = vmax.f32 %v1571_v56, 0.0 }
 0x21f   : > { %v2384_v59 = vpop.f32.mrf.mxu1 }
 0x220   : > { %v1574_v60 = vadd.f32 %v1573_v58, %v1413_v57  ;;  %v2385_v61 = vadd.f32 %v2384_v59, %v2383_v55 }
 0x221   : > { %v2386_v62 = vpop.f32.mrf.mxu1 }
 0x222   : > { %v1614_v0 = vmax.f32 %v1574_v60, 0.0  ;;  %v1418_v2 = vadd.f32 %v2385_v61, %v3051_v11 }
 0x223   : > { %v2387_v3 = vpop.f32.mrf.mxu1 }
 0x224   : > { %v1631_v4 = vpack.c.bf16 %v1614_v0, %v1613_v63  ;;  %v2388_v5 = vadd.f32 %v2387_v3, %v2386_v62  ;;  %v1579_v6 = vadd.f32 %v2521_v30, %v1418_v2 }
 0x226   : > { %v1421_v7 = vadd.f32 %v2388_v5, %v3051_v11  ;;  %2565 = vmatprep.mubr.msk.bf16.mxu0 %vm1692_vm4, %v1631_v4  ;;  %v1615_v9 = vmax.f32 %v1579_v6, 0.0 }
 0x228   : > { %v1582_v8 = vadd.f32 %v2522_v48, %v1421_v7  ;;  %v1955_v48 = vld [vmem:[#allocation2] sm:$0x1] }
 0x229   : > { %1958 = vperm.xlu0 %2593, %v1955_v48  }
 0x22a   : > { %v1616_v49 = vmax.f32 %v1582_v8, 0.0 }
 0x22c   : > { %v1632_v53 = vpack.c.bf16 %v1616_v49, %v1615_v9 }
 0x22e   : > { %2566 = vmatmul.mubr.msk.bf16.gmra.mxu0 %vm1692_vm4, %v1632_v53 }
 0x28b   : > { %v2539_v12 = vpop.f32.mrf.mxu0 }
 0x28c   : > { %v1788_v14 = vadd.f32 %v2539_v12, %v3104_v13 }
 0x28d   : > { %v1779_v17 = vpop.f32.mrf.mxu0 }
 0x28e   : > { %v1780_v11 = vadd.f32 %v3104_v13, %v1779_v17  ;;  %v1908_v18 = vmax.f32 %v1788_v14, 0.0 }
 0x28f   : > { %v2540_v15 = vpop.f32.mrf.mxu0 }
 0x290   : > { %v1791_v16 = vadd.f32 %v2540_v15, %v3104_v13  ;;  %v1906_v10 = vmax.f32 %v1780_v11, 0.0 }
 0x291   : > { %v1782_v47 = vpop.f32.mrf.mxu0 }
 0x292   : > { %v1909_v20 = vmax.f32 %v1791_v16, 0.0  ;;  %v1783_v21 = vadd.f32 %v3104_v13, %v1782_v47 }
 0x293   : > { %v2543_v22 = vpop.f32.mrf.mxu0 }
 0x294   : > { %v3110_v23 = vpack.c.bf16 %v1909_v20, %v1908_v18  ;;  %v1907_v52 = vmax.f32 %v1783_v21, 0.0  ;;  %v1804_v19 = vadd.f32 %v2543_v22, %v3104_v13 }
 0x295   : > { %v1795_v24 = vpop.f32.mrf.mxu0 }
 0x296   : > { %v3112_v38 = vpack.c.bf16 %v1907_v52, %v1906_v10  ;;  %v1796_v26 = vadd.f32 %v3104_v13, %v1795_v24  ;;  %v1912_v29 = vmax.f32 %v1804_v19, 0.0 }
 0x297   : > { %v2544_v25 = vpop.f32.mrf.mxu0 }
 0x298   : > { %v1807_v27 = vadd.f32 %v2544_v25, %v3104_v13  ;;  %v1910_v32 = vmax.f32 %v1796_v26, 0.0 }
 0x299   : > { %v1798_v28 = vpop.f32.mrf.mxu0 }
 0x29a   : > { %v1913_v30 = vmax.f32 %v1807_v27, 0.0  ;;  %v1799_v31 = vadd.f32 %v3104_v13, %v1798_v28 }
 0x29c   : > { %v3118_v33 = vpack.c.bf16 %v1913_v30, %v1912_v29  ;;  %v1911_v1 = vmax.f32 %v1799_v31, 0.0 }
 0x29e   : > { %v3120_v34 = vpack.c.bf16 %v1911_v1, %v1910_v32  ;;  %v3122_v35 = vpop.f32.mrf.mxu0 }
 0x2a0   : > { %v3124_v36 = vpop.f32.mrf.mxu0 }
 0x2a2   : > { %v2548_v37 = vpop.f32.mrf.mxu0 }
 0x2a3   : > { %v1823_v48 = vadd.f32 %v2548_v37, %v3104_v13 }
 0x2a4   : > { %v3126_v39 = vpop.f32.mrf.mxu0 }
 0x2a5   : > { %v1815_v37 = vadd.f32 %v3104_v13, %v3126_v39 }
 0x2ae   : > { %v2551_v40 = vpop.f32.mrf.mxu0 }
 0x2af   : > { %v1836_v14 = vadd.f32 %v2551_v40, %v3104_v13 }
 0x2b0   : > { %v1827_v42 = vpop.f32.mrf.mxu0 }
 0x2b1   : > { %v1920_v18 = vmax.f32 %v1836_v14, 0.0  ;;  %v1828_v26 = vadd.f32 %v3104_v13, %v1827_v42 }
 0x2b2   : > { %v2552_v43 = vpop.f32.mrf.mxu0 }
 0x2b3   : > { %v1839_v12 = vadd.f32 %v2552_v43, %v3104_v13  ;;  %v1918_v40 = vmax.f32 %v1828_v26, 0.0 }
 0x2b4   : > { %v1830_v50 = vpop.f32.mrf.mxu0 }
 0x2b5   : > { %v1921_v11 = vmax.f32 %v1839_v12, 0.0  ;;  %v1831_v22 = vadd.f32 %v3104_v13, %v1830_v50 }
 0x2b7   : > { %v1945_v52 = vpack.c.bf16 %v1921_v11, %v1920_v18  ;;  %v1919_v30 = vmax.f32 %v1831_v22, 0.0  ;;  %v1979_v18 = vsel %vm1965_vm5, %v3118_v33, 0  ;;  %v1970_v33 = vsel %vm1965_vm5, %v3112_v38, 0 }
 0x2b9   : > { %v1991_v1 = vsel %vm1965_vm5, %v1945_v52, 0  ;;  %v1944_v42 = vpack.c.bf16 %v1919_v30, %v1918_v40 }
 0x2be   : > { %v2555_v51 = vpop.f32.mrf.mxu0 }
 0x2bf   : > { %v1852_v55 = vadd.f32 %v2555_v51, %v3104_v13  ;;  %v1820_v51 = vadd.f32 %v3122_v35, %v3104_v13  ;;  %v1812_v35 = vadd.f32 %v3104_v13, %v3124_v36 }
 0x2c0   : > { %v1843_v54 = vpop.f32.mrf.mxu0 }
 0x2c1   : > { %v1844_v57 = vadd.f32 %v3104_v13, %v1843_v54  ;;  %v1924_v60 = vmax.f32 %v1852_v55, 0.0  ;;  %v1917_v55 = vmax.f32 %v1823_v48, 0.0  ;;  %v1914_v12 = vmax.f32 %v1812_v35, 0.0 }
 0x2c2   : > { %v2556_v56 = vpop.f32.mrf.mxu0 }
 0x2c3   : > { %v1855_v58 = vadd.f32 %v2556_v56, %v3104_v13  ;;  %v1922_v63 = vmax.f32 %v1844_v57, 0.0 }
 0x2c4   : > { %v1846_v59 = vpop.f32.mrf.mxu0 }
 0x2c5   : > { %v1925_v61 = vmax.f32 %v1855_v58, 0.0  ;;  %v1847_v62 = vadd.f32 %v3104_v13, %v1846_v59  ;;  %v1988_v58 = vsel %vm1965_vm5, %v1944_v42, 0  ;;  %v1916_v59 = vmax.f32 %v1820_v51, 0.0 }
 0x2c7   : > { %v3139_v0 = vpack.c.bf16 %v1925_v61, %v1924_v60  ;;  %v1923_v2 = vmax.f32 %v1847_v62, 0.0  ;;  %v1943_v61 = vpack.c.bf16 %v1917_v55, %v1916_v59 }
 0x2c9   : > { %v3141_v3 = vpack.c.bf16 %v1923_v2, %v1922_v63  ;;  %v1915_v2 = vmax.f32 %v1815_v37, 0.0 }
 0x2ce   : > { %v2559_v4 = vpop.f32.mrf.mxu0 }
 0x2d0   : > { %v3143_v5 = vpop.f32.mrf.mxu0 }
 0x2d2   : > { %v2560_v6 = vpop.f32.mrf.mxu0 }
 0x2d4   : > { %v3145_v7 = vpop.f32.mrf.mxu0 }
 0x2d5   : > { %v1863_v36 = vadd.f32 %v3104_v13, %v3145_v7  ;;  %v1976_v7 = vsel %vm1965_vm5, %v3120_v34, 0  ;;  %v2653_v34 = vmov 1966171168  }
 0x2de   : > { %v2563_v8 = vpop.f32.mrf.mxu0 }
 0x2df   : > { %v1884_v43 = vadd.f32 %v2563_v8, %v3104_v13  ;;  %v1871_v8 = vadd.f32 %v2560_v6, %v3104_v13  ;;  %v1860_v6 = vadd.f32 %v3104_v13, %v3143_v5  ;;  %v2062_v5 = vunpack.c.l.s4 %v2653_v34 }
 0x2e0   : > { %v1875_v9 = vpop.f32.mrf.mxu0 }
 0x2e1   : > { %v1932_v54 = vmax.f32 %v1884_v43, 0.0  ;;  %v1876_v60 = vadd.f32 %v3104_v13, %v1875_v9  ;;  %v1868_v9 = vadd.f32 %v2559_v4, %v3104_v13  ;;  %v1929_v14 = vmax.f32 %v1871_v8, 0.0 }
 0x2e2   : > { %v2564_v49 = vpop.f32.mrf.mxu0 }
 0x2e3   : > { %v1887_v31 = vadd.f32 %v2564_v49, %v3104_v13  ;;  %v1930_v63 = vmax.f32 %v1876_v60, 0.0  ;;  %v1928_v39 = vmax.f32 %v1868_v9, 0.0 }
 0x2e4   : > { %v1878_v53 = vpop.f32.mrf.mxu0 }
 0x2e5   : > { %v1933_v50 = vmax.f32 %v1887_v31, 0.0  ;;  %v1879_v57 = vadd.f32 %v3104_v13, %v1878_v53  ;;  %v1985_v53 = vsel %vm1965_vm5, %v1943_v61, 0 }
 0x2e7   : > { %v1951_v56 = vpack.c.bf16 %v1933_v50, %v1932_v54  ;;  %v1931_v62 = vmax.f32 %v1879_v57, 0.0 }
 0x2e9   : > { %v1950_v49 = vpack.c.bf16 %v1931_v62, %v1930_v63 }
 0x2ee   : > { %v2567_v17 = vpop.f32.mrf.mxu0 }
 0x2ef   : > { %v1900_v16 = vadd.f32 %v2567_v17, %v3104_v13  ;;  %v1942_v17 = vpack.c.bf16 %v1915_v2, %v1914_v12 }
 0x2f0   : > { %v1891_v15 = vpop.f32.mrf.mxu0 }
 0x2f1   : > { %v1892_v20 = vadd.f32 %v3104_v13, %v1891_v15  ;;  %v1936_v24 = vmax.f32 %v1900_v16, 0.0  ;;  %v1949_v15 = vpack.c.bf16 %v1929_v14, %v1928_v39  ;;  %v1982_v11 = vsel %vm1965_vm5, %v1942_v17, 0 }
 0x2f2   : > { %v2568_v47 = vpop.f32.mrf.mxu0  ;;  %v1927_v16 = vmax.f32 %v1863_v36, 0.0 }
 0x2f3   : > { %v1903_v21 = vadd.f32 %v2568_v47, %v3104_v13  ;;  %v1934_v27 = vmax.f32 %v1892_v20, 0.0  ;;  %v1926_v47 = vmax.f32 %v1860_v6, 0.0  ;;  %v1959_v20 = vpop.permute.xlu0 %1958 }
 0x2f4   : > { %v1894_v10 = vpop.f32.mrf.mxu0 }
 0x2f5   : > { %v1937_v19 = vmax.f32 %v1903_v21, 0.0  ;;  %v1895_v25 = vadd.f32 %v3104_v13, %v1894_v10  ;;  %v1948_v4 = vpack.c.bf16 %v1927_v16, %v1926_v47  ;;  %v1973_v13 = vsel %vm1965_vm5, %v3110_v23, 0 }
 0x2f6   : > { %v2063_v21 = vunpack.c.0.s8 %v2062_v5 }
 0x2f7   : > { %v1953_v28 = vpack.c.bf16 %v1937_v19, %v1936_v24  ;;  %v1935_v29 = vmax.f32 %v1895_v25, 0.0 }
 0x2f8   : > { %v2066_v52 = vsub.s32 %v2063_v21, %v2876_v45 }
 0x2f9   : > { %v1952_v32 = vpack.c.bf16 %v1935_v29, %v1934_v27  ;;  %2575 = vmatprep.subr.msk.bf16.mxu1 %vm1965_vm5, %v1953_v28 }
 0x2fa   : > { %2432 = vmatpush3.bf16.xpose.msra.mxu1 %v1991_v1 }
 0x2fb   : > { %2576 = vmatprep.subr.msk.bf16.mxu1 %vm1965_vm5, %v1952_v32 }
 0x302   : > { %2434 = vmatpush3.bf16.xpose.msra.mxu1 %v1988_v58 }
 0x303   : > { %2577 = vmatprep.subr.msk.bf16.mxu1 %vm1965_vm5, %v1951_v56 }
 0x30a   : > { %2436 = vmatpush3.bf16.xpose.msra.mxu1 %v1985_v53 }
 0x30b   : > { %2578 = vmatprep.subr.msk.bf16.mxu1 %vm1965_vm5, %v1950_v49 }
 0x312   : > { %2438 = vmatpush3.bf16.xpose.msra.mxu1 %v1982_v11 }
 0x313   : > { %2579 = vmatprep.subr.msk.bf16.mxu1 %vm1965_vm5, %v1949_v15 }
 0x31a   : > { %2440 = vmatpush3.bf16.xpose.msra.mxu1 %v1979_v18 }
 0x31b   : > { %2580 = vmatprep.subr.msk.bf16.mxu1 %vm1965_vm5, %v1948_v4 }
 0x322   : > { %2442 = vmatpush3.bf16.xpose.msra.mxu1 %v1976_v7 }
 0x323   : > { %2581 = vmatprep.subr.msk.bf16.mxu1 %vm1965_vm5, %v3139_v0  ;;  %v1964_v0 = vrot.slane %v1959_v20, %v380_v46 }
 0x32a   : > { %2444 = vmatpush3.bf16.xpose.msra.mxu1 %v1973_v13 }
 0x32b   : > { %2582 = vmatprep.subr.msk.bf16.mxu1 %vm1965_vm5, %v3141_v3 }
 0x332   : > { %2446 = vmatpush3.bf16.xpose.msra.mxu1 %v1970_v33 }
 0x339   : > { %2448 = vmatmul.mubr.msk.bf16.vlgmr.msra.gmra.mxu1 %vm1965_vm5, %v3131_v41 }
 0x3f9   : > { %v2051_v23 = vpop.f32.mrf.mxu1 }
 0x3fa   : > { %v2052_v10 = vadd.f32 %v2051_v23, %v1964_v0 }
 0x3fb   : > { %v2053_v22 = vpop.f32.mrf.mxu1 }
 0x3fc   : > { %v2054_v3 = vadd.f32 %v2053_v22, %v1964_v0 }
 0x3fd   : > { %v2055_v38 = vpop.f32.mrf.mxu1 }
 0x3fe   : > { %v2060_v24 = vcombine.low %v2052_v10, %v2054_v3 }
 0x3ff   : > { %v2056_v19 = vpop.f32.mrf.mxu1 }
 0x400   : > { %v2067_v41 = vrot.slane %v2060_v24, %v2066_v52 }
 0x402   : > { %v2074_v25 = vrot.slane %v2067_v41, %v2066_v52 }
 0x404   : > { %2080 = vst.msk [vmem:[%s334_s14] sm:$0x3] %vm2078_vm6, %v2074_v25 }
 0x405 PF: > { %s21_s11 = sadd.s32 1, %s2650_s11  }
 0x406   : > { %p18_p5 = scmp.ge.s32.totalorder %s21_s11, 4  }
 0x408   :  { %20 = sbr.rel (!%p18_p5) target bundleno = 3 (0x3), region = 86 }

</bundles_post_ra>
